<compile_context>
chip_gen: v7x
topology: tpu7x:2x2x1
jax: 0.10.0
libtpu: 0.0.40
codegen_flags: <defaults>
</compile_context>

<pallas_src>
import functools

import jax
import jax.numpy as jnp
from jax import lax
from jax.experimental import pallas as pl
from jax.experimental.pallas import tpu as pltpu


TILE_T = 512  # frame-axis tile: multiple of 128 lanes; amortizes per-step overhead


# ----------------------------------------------------------------------------
# Pallas kernel: ExpandFrame, one T tile per grid point, all batches per block.
#   c:   (B, L, 1)    f32   Gaussian centers per input token
#   enc: (B, D, L)    bf16  channel-first encoder features
#   out: (B, D, TT)         channel-first expanded frames for this T tile
# ----------------------------------------------------------------------------
def _expand_frame_kernel(c_ref, enc_ref, out_ref):
    L = c_ref.shape[1]
    TT = out_ref.shape[2]

    # Frame indices covered by this tile: j*TT ... j*TT + TT - 1.
    t_base = pl.program_id(0) * TT
    t = (lax.broadcasted_iota(jnp.int32, (L, TT), 1) + t_base).astype(jnp.float32)

    diff = t[None, :, :] - c_ref[...]            # (B, L, TT), lane-broadcast of c
    w1 = jnp.exp(-0.1 * diff * diff)             # (B, L, TT) f32 (EUP slot)

    # Normalizer over the token axis; clamp avoids 0/0 on far padded frames.
    w2 = jnp.sum(w1, axis=1, keepdims=True)                        # (B, 1, TT)
    inv_w2 = pl.reciprocal(jnp.maximum(w2, 1e-6), approx=False)    # exact divide

    # MXU batched matmul in native layout: (B, D, L) @ (B, L, TT) -> (B, D, TT),
    # bf16 operands, f32 accumulation.  Normalization is applied as a post-scale
    # so the divide collapses to TT reciprocals + one broadcast multiply.
    raw = jnp.einsum("bdl,blt->bdt", enc_ref[...], w1.astype(jnp.bfloat16),
                     preferred_element_type=jnp.float32)           # (B, D, TT) f32
    out_ref[...] = (raw * inv_w2).astype(out_ref.dtype)


def expand_frame(encoder_features_cf, duration, *, max_frames, tile_t=TILE_T,
                 out_dtype=jnp.bfloat16):
    """Pallas ExpandFrame on channel-first features. Fully jittable (no host sync).

    encoder_features_cf: (B, D, L) float32/bf16 (channel-first)
    duration:            (B, L)    float32
    max_frames:          static int upper bound on round(max(sum(duration))) + 1
    returns:             (B, D, T_pad), T_pad = max_frames bucketed up to tile_t.
                         Valid frames are [0, round(max(sum(duration)))]; the
                         padded tail is the consumer's responsibility to trim
                         or mask (kept out of this path to avoid a full-output
                         lane-dim slice copy).
    """
    B, D, L = encoder_features_cf.shape
    t_pad = pl.cdiv(int(max_frames), tile_t) * tile_t

    e = jnp.cumsum(duration, axis=-1).astype(jnp.float32)
    c = (e - 0.5 * jnp.round(duration))[:, :, None]                # (B, L, 1)

    # Cast once here (halves enc DMA bytes; no per-step in-kernel cast).
    enc_bf16 = encoder_features_cf.astype(jnp.bfloat16)

    # TODO(synk): if L grows to hundreds of tokens, add a banded variant that
    # prefetches per-tile token ranges via PrefetchScalarGridSpec and narrows
    # the L contraction; irrelevant at L = 8.
    return pl.pallas_call(
        _expand_frame_kernel,
        out_shape=jax.ShapeDtypeStruct((B, D, t_pad), out_dtype),
        grid_spec=pltpu.PrefetchScalarGridSpec(
            num_scalar_prefetch=0,
            grid=(t_pad // tile_t,),
            in_specs=[
                pl.BlockSpec((B, L, 1), lambda j: (0, 0, 0)),
                pl.BlockSpec((B, D, L), lambda j: (0, 0, 0)),
            ],
            out_specs=pl.BlockSpec((B, D, tile_t), lambda j: (0, 0, j)),
        ),
        compiler_params=pltpu.CompilerParams(
            dimension_semantics=("parallel",)),
    )(c, enc_bf16)


# ----------------------------------------------------------------------------
# EETS (JAX/Pallas port)
# ----------------------------------------------------------------------------
class EETSPallas:
    def __init__(self, key,
                 phone_embedding_dim=128, tone_embedding_dim=64,
                 prosody_embedding_dim=32, seg_embedding_dim=32,
                 spk_embedding_dim=64, z_dim=64):
        self.encoder_dim = (phone_embedding_dim + tone_embedding_dim +
                            prosody_embedding_dim + seg_embedding_dim)
        self.z_dim = z_dim
        k = jax.random.split(key, 5)
        scale = 0.02
        self.phone_embed = scale * jax.random.normal(k[0], (100, phone_embedding_dim), jnp.float32)
        self.tone_embed = scale * jax.random.normal(k[1], (8, tone_embedding_dim), jnp.float32)
        self.prosody_embed = scale * jax.random.normal(k[2], (4, prosody_embedding_dim), jnp.float32)
        self.seg_embed = scale * jax.random.normal(k[3], (4, seg_embedding_dim), jnp.float32)
        self.speaker_embed = scale * jax.random.normal(k[4], (100, spk_embedding_dim), jnp.float32)

    def __call__(self, phone, tone, prosody, segment, noise, speakers, duration,
                 *, max_frames):
        # Embedding lookups + transpose(1, 2) to channel-first, as in PyTorch.
        phone_inputs = jnp.take(self.phone_embed, phone, axis=0).transpose(0, 2, 1)
        tone_inputs = jnp.take(self.tone_embed, tone, axis=0).transpose(0, 2, 1)
        prosody_inputs = jnp.take(self.prosody_embed, prosody, axis=0).transpose(0, 2, 1)
        segment_inputs = jnp.take(self.seg_embed, segment, axis=0).transpose(0, 2, 1)
        encoder_inputs = jnp.concatenate(
            [phone_inputs, tone_inputs, prosody_inputs, segment_inputs], axis=1)  # (B, D, L)
        speaker_inputs = jnp.take(self.speaker_embed, speakers, axis=0).squeeze(1)  # (B, spk)

        # TODO(synk): `Encoder` class is not defined in the reference source; using
        # an identity encoder (channel-first features passed straight through)
        # and the input duration as the predicted duration.
        encoder_features_cf = encoder_inputs        # (B, D, L)
        predict_duration = duration

        # ExpandFrame — Pallas kernel.  Consumes channel-first, emits channel-
        # first (B, D, T_pad), i.e. already `decoder_inputs.transpose(1, 2)`.
        decoder_inputs_cf = expand_frame(
            encoder_features_cf, duration, max_frames=max_frames)  # (B, D, T_pad) bf16

        z_inputs = jnp.concatenate([noise, speaker_inputs], axis=1)  # (B, z+spk)

        # TODO(synk): `Decoder` class is not defined in the reference source; using
        # a pass-through of its (B, D, T_pad) input (z_inputs unused -> DCE'd).
        outputs = decoder_inputs_cf
        del z_inputs
        return outputs, predict_duration


# Pure-JAX f32 reference of ExpandFrame (test only; matches the PyTorch math).
def _expand_frame_ref(enc_cf, duration):
    tot = jnp.round(jnp.sum(duration, axis=-1))
    n_frames = int(jnp.max(tot)) + 1                     # host read: test only
    t = jnp.arange(n_frames, dtype=jnp.float32)[None, None, :]       # (1, 1, T)
    e = jnp.cumsum(duration, axis=-1).astype(jnp.float32)
    c = (e - 0.5 * jnp.round(duration))[:, :, None]                  # (B, L, 1)
    w1 = jnp.exp(-0.1 * (t - c) ** 2)                                # (B, L, T)
    w2 = jnp.sum(w1, axis=1, keepdims=True)
    w = w1 / w2
    return jnp.einsum("bdl,blt->bdt", enc_cf, w), n_frames


if __name__ == "__main__":
    key = jax.random.PRNGKey(0)
    (k_model, k_phone, k_tone, k_pros, k_seg,
     k_noise, k_spk, k_dur) = jax.random.split(key, 8)

    B, L = 2, 8
    z_dim = 64

    model = EETSPallas(k_model, z_dim=z_dim)

    phone = jax.random.randint(k_phone, (B, L), 0, 100, dtype=jnp.int32)
    tone = jax.random.randint(k_tone, (B, L), 0, 8, dtype=jnp.int32)
    prosody = jax.random.randint(k_pros, (B, L), 0, 4, dtype=jnp.int32)
    segment = jax.random.randint(k_seg, (B, L), 0, 4, dtype=jnp.int32)
    noise = jax.random.normal(k_noise, (B, z_dim), jnp.float32)
    speakers = jax.random.randint(k_spk, (B, 1), 0, 100, dtype=jnp.int32)
    duration = jax.random.uniform(k_dur, (B, L), jnp.float32, minval=1.0, maxval=4.0)

    # Static frame bound from the known duration range (no data-dependent trace,
    # no device->host sync inside the forward pass).
    MAX_FRAMES = L * 4 + 1

    @functools.partial(jax.jit, static_argnames=("max_frames",))
    def forward(phone, tone, prosody, segment, noise, speakers, duration, max_frames):
        return model(phone, tone, prosody, segment, noise, speakers, duration,
                     max_frames=max_frames)

    outputs, predict_duration = forward(phone, tone, prosody, segment,
                                        noise, speakers, duration, MAX_FRAMES)
    jax.block_until_ready(outputs)
    jax.block_until_ready(predict_duration)

    # Correctness check of the kernel hot path against the f32 reference
    # (valid frames only; generous tolerance for bf16 operands/output).
    enc_cf_ref = jnp.concatenate(
        [jnp.take(model.phone_embed, phone, axis=0).transpose(0, 2, 1),
         jnp.take(model.tone_embed, tone, axis=0).transpose(0, 2, 1),
         jnp.take(model.prosody_embed, prosody, axis=0).transpose(0, 2, 1),
         jnp.take(model.seg_embed, segment, axis=0).transpose(0, 2, 1)], axis=1)
    ref_out, n_valid = _expand_frame_ref(enc_cf_ref, duration)
    got = outputs[:, :, :n_valid].astype(jnp.float32)
    if not bool(jnp.allclose(got, ref_out, rtol=1e-1, atol=3e-3)):
        raise AssertionError("Pallas ExpandFrame mismatch vs f32 reference")

    print("KERNEL_OK")
</pallas_src>

<mosaic_0001>
module attributes {stable_mosaic.version = 11 : i64} {
  func.func @_expand_frame_kernel(%arg0: i32, %arg1: memref<2x8x1xf32, #tpu.memory_space<vmem>>, %arg2: memref<2x256x8xbf16, #tpu.memory_space<vmem>>, %arg3: memref<2x256x512xbf16, #tpu.memory_space<vmem>>) attributes {dimension_semantics = [#tpu.dimension_semantics<parallel>], iteration_bounds = array<i64: 1>, scalar_prefetch = 0 : i64, scratch_operands = 0 : i64, tpu.core_type = #tpu.core_type<tc>, window_params = [{pipeline_mode = #tpu.pipeline_mode<synchronous>, transform_indices = @transform_0, window_bounds = array<i64: 2, 8, 1>}, {pipeline_mode = #tpu.pipeline_mode<synchronous>, transform_indices = @transform_1, window_bounds = array<i64: 2, 256, 8>}, {transform_indices = @transform_2, window_bounds = array<i64: 2, 256, 512>}]} {
    %c512_i32 = arith.constant 512 : i32
    %0 = arith.muli %arg0, %c512_i32 : i32
    %1 = tpu.iota {dimensions = array<i32: 1>} : vector<8x512xi32>
    %2 = vector.broadcast %0 : i32 to vector<8x512xi32>
    %3 = arith.addi %1, %2 : vector<8x512xi32>
    %4 = arith.sitofp %3 : vector<8x512xi32> to vector<8x512xf32>
    %5 = vector.shape_cast %4 : vector<8x512xf32> to vector<1x8x512xf32>
    %c0 = arith.constant 0 : index
    %c0_0 = arith.constant 0 : index
    %c0_1 = arith.constant 0 : index
    %6 = vector.load %arg1[%c0, %c0_0, %c0_1] : memref<2x8x1xf32, #tpu.memory_space<vmem>>, vector<2x8x1xf32>
    %7 = vector.broadcast %5 : vector<1x8x512xf32> to vector<2x8x512xf32>
    %8 = vector.broadcast %6 : vector<2x8x1xf32> to vector<2x8x512xf32>
    %9 = arith.subf %7, %8 : vector<2x8x512xf32>
    %cst = arith.constant -1.000000e-01 : f32
    %10 = vector.broadcast %cst : f32 to vector<2x8x512xf32>
    %11 = arith.mulf %10, %9 : vector<2x8x512xf32>
    %12 = arith.mulf %11, %9 : vector<2x8x512xf32>
    %13 = math.exp %12 : vector<2x8x512xf32>
    %cst_2 = arith.constant dense<0.000000e+00> : vector<2x512xf32>
    %14 = vector.multi_reduction <add>, %13, %cst_2 [1] : vector<2x8x512xf32> to vector<2x512xf32>
    %15 = vector.shape_cast %14 : vector<2x512xf32> to vector<2x1x512xf32>
    %cst_3 = arith.constant 9.99999997E-7 : f32
    %16 = vector.broadcast %cst_3 : f32 to vector<2x1x512xf32>
    %17 = arith.maximumf %15, %16 : vector<2x1x512xf32>
    %18 = tpu.reciprocal %17 : vector<2x1x512xf32> -> vector<2x1x512xf32>
    %c0_4 = arith.constant 0 : index
    %c0_5 = arith.constant 0 : index
    %c0_6 = arith.constant 0 : index
    %19 = vector.load %arg2[%c0_4, %c0_5, %c0_6] : memref<2x256x8xbf16, #tpu.memory_space<vmem>>, vector<2x256x8xbf16>
    %20 = arith.truncf %13 : vector<2x8x512xf32> to vector<2x8x512xbf16>
    "tpu.trace_start"() <{level = 10 : i32, message = "bdl,blt->bdt"}> : () -> ()
    %cst_7 = arith.constant dense<0.000000e+00> : vector<2x256x512xf32>
    %21 = tpu.matmul %19, %20, %cst_7 {dimension_numbers = #tpu.dot_dimension_numbers<[2], [1], [1], [2], [0, 0, 0, 1, 1, 2], [0], [0]>} : vector<2x256x8xbf16>, vector<2x8x512xbf16>, vector<2x256x512xf32> -> vector<2x256x512xf32>
    "tpu.trace_stop"() : () -> ()
    %22 = vector.broadcast %18 : vector<2x1x512xf32> to vector<2x256x512xf32>
    %23 = arith.mulf %21, %22 : vector<2x256x512xf32>
    %24 = arith.truncf %23 : vector<2x256x512xf32> to vector<2x256x512xbf16>
    %c0_8 = arith.constant 0 : index
    %c0_9 = arith.constant 0 : index
    %c0_10 = arith.constant 0 : index
    %25 = vector.load %arg3[%c0_8, %c0_9, %c0_10] : memref<2x256x512xbf16, #tpu.memory_space<vmem>>, vector<2x256x512xbf16>
    tpu.vector_store %arg3[%c0_8, %c0_9, %c0_10], %24 {strides = array<i32>} : memref<2x256x512xbf16, #tpu.memory_space<vmem>>, vector<2x256x512xbf16>,
    return
  }
  func.func @transform_0(%arg0: i32) -> (i32, i32, i32) {
    %c0_i32 = arith.constant 0 : i32
    %c0_i32_0 = arith.constant 0 : i32
    %c0_i32_1 = arith.constant 0 : i32
    %c0_i32_2 = arith.constant 0 : i32
    return %c0_i32, %c0_i32_0, %c0_i32_1 : i32, i32, i32
  }
  func.func @transform_1(%arg0: i32) -> (i32, i32, i32) {
    %c0_i32 = arith.constant 0 : i32
    %c0_i32_0 = arith.constant 0 : i32
    %c0_i32_1 = arith.constant 0 : i32
    %c0_i32_2 = arith.constant 0 : i32
    return %c0_i32, %c0_i32_0, %c0_i32_1 : i32, i32, i32
  }
  func.func @transform_2(%arg0: i32) -> (i32, i32, i32) {
    %c0_i32 = arith.constant 0 : i32
    %c0_i32_0 = arith.constant 0 : i32
    %c0_i32_1 = arith.constant 0 : i32
    return %c0_i32, %c0_i32_0, %arg0 : i32, i32, i32
  }
}

</mosaic_0001>

<bundles_post_ra>
// kernel: forward.1
= control target key start
LH: loop header
LB: loop body
LE: loop exit
PB: predicated region body
PF: predicated region fallthrough
CT: control target
= control target key end

     0   :  { %v2887_v1 = vmov 0   ;;  %s3477_s0 = inlined_call_operand.vmem [shape: f32[2,8,1], index: 0, kind: input, shape index: {}]   ;;  %s3478_s1 = inlined_call_operand.vmem [shape: bf16[2,256,8], index: 1, kind: input, shape index: {}]   ;;  %s3479_s2 = inlined_call_operand.hbm [shape: bf16[2,256,512], index: 2, kind: output, shape index: {}]  }
   0x1   :  { %v28_v0 = vld [vmem:[%s3477_s0] sm:$0xff]  ;;  %2798 = vset.pattern.permute.xlu0 %v2887_v1  ;;  %390 = vmatprep.mubr.bf16.mxu0 %v2887_v1  ;;  %v29_v2 = vld [vmem:[%s3477_s0 + $0x8] sm:$0xff] }
   0x2   :  { %32 = vperm.xlu0 %2798, %v28_v0   ;;  %583 = vmatprep.mubr.bf16.mxu1 %v2887_v1 }
   0x6   :  { %37 = vperm.xlu0 %2798, %v29_v2  }
   0x7   :  { %7 = vsyncpa [#allocation3], 0  ;;  %v14_v3 = vlaneseq  ;;  %vm345_vm0 = vcmask 1043456   ;;  %v2799_v55 = vld [vmem:[%s3478_s1] sm:$0xff]   ;;  %vm296_vm1 = vcmask 64512   ;;  %v2800_v59 = vld [vmem:[%s3478_s1 + $0x8] sm:$0xff]  }
   0x9   :  { %v15_v4 = vand.u32 127, %v14_v3 }
   0xb   :  { %v16_v5 = vadd.s32 128, %v15_v4  ;;  %v17_v6 = vadd.s32 256, %v15_v4  ;;  %v18_v7 = vadd.s32 384, %v15_v4  ;;  %v24_v8 = vcvt.s32.f32 %v15_v4  ;;  %v2801_v4 = vld [vmem:[%s3478_s1 + $0x10] sm:$0xff]  }
   0xd   :  { %v25_v9 = vcvt.s32.f32 %v16_v5  ;;  %v26_v10 = vcvt.s32.f32 %v17_v6  ;;  %v27_v11 = vcvt.s32.f32 %v18_v7  ;;  %v2802_v6 = vld [vmem:[%s3478_s1 + $0x18] sm:$0xff]   ;;  %v2803_v7 = vld [vmem:[%s3478_s1 + $0x20] sm:$0xff]  }
  0x81   :  { %v33_v12 = vpop.permute.xlu0 %32 }
  0x82   :  { %v40_v13 = vsub.f32 %v24_v8, %v33_v12  ;;  %v41_v14 = vsub.f32 %v25_v9, %v33_v12  ;;  %v42_v15 = vsub.f32 %v26_v10, %v33_v12  ;;  %v43_v16 = vsub.f32 %v27_v11, %v33_v12  ;;  %v2808_v12 = vld [vmem:[%s3478_s1 + $0x48] sm:$0xff]  }
  0x84   :  { %v48_v17 = vmul.f32 -0.1, %v40_v13  ;;  %v49_v18 = vmul.f32 -0.1, %v41_v14  ;;  %v50_v19 = vmul.f32 -0.1, %v42_v15 }
  0x85   :  { %v38_v20 = vpop.permute.xlu0 %37  ;;  %v51_v21 = vmul.f32 -0.1, %v43_v16 }
  0x86   :  { %v45_v22 = vsub.f32 %v25_v9, %v38_v20  ;;  %v56_v23 = vmul.f32 %v48_v17, %v40_v13  ;;  %v57_v24 = vmul.f32 %v49_v18, %v41_v14  ;;  %v58_v25 = vmul.f32 %v50_v19, %v42_v15  ;;  %v2805_v9 = vld [vmem:[%s3478_s1 + $0x30] sm:$0xff]   ;;  %v2810_v14 = vld [vmem:[%s3478_s1 + $0x58] sm:$0xff]   ;;  %v2811_v15 = vld [vmem:[%s3478_s1 + $0x60] sm:$0xff]  }
  0x87   :  { %v59_v26 = vmul.f32 %v51_v21, %v43_v16  ;;  %v47_v28 = vsub.f32 %v27_v11, %v38_v20  ;;  %v44_v31 = vsub.f32 %v24_v8, %v38_v20  ;;  %v46_v34 = vsub.f32 %v26_v10, %v38_v20  ;;  %v2804_v8 = vld [vmem:[%s3478_s1 + $0x28] sm:$0xff]   ;;  %v2806_v10 = vld [vmem:[%s3478_s1 + $0x38] sm:$0xff]   ;;  %v2807_v11 = vld [vmem:[%s3478_s1 + $0x40] sm:$0xff]  }
  0x88   :  { %v53_v27 = vmul.f32 -0.1, %v45_v22  ;;  %v64_v29 = vmul.f32 1.442695, %v56_v23  ;;  %v66_v30 = vmul.f32 1.442695, %v57_v24 }
  0x89   :  { %v68_v33 = vmul.f32 1.442695, %v58_v25  ;;  %v70_v35 = vmul.f32 1.442695, %v59_v26  ;;  %v55_v37 = vmul.f32 -0.1, %v47_v28 }
  0x8a   :  { %v61_v32 = vmul.f32 %v53_v27, %v45_v22  ;;  %2831 = vpow2.f32 %v64_v29  ;;  %v52_v38 = vmul.f32 -0.1, %v44_v31  ;;  %v54_v39 = vmul.f32 -0.1, %v46_v34  ;;  %v2809_v13 = vld [vmem:[%s3478_s1 + $0x50] sm:$0xff]   ;;  %v2812_v16 = vld [vmem:[%s3478_s1 + $0x68] sm:$0xff]  }
  0x8b   :  { %2833 = vpow2.f32 %v66_v30  ;;  %v63_v40 = vmul.f32 %v55_v37, %v47_v28  ;;  %v2813_v17 = vld [vmem:[%s3478_s1 + $0x70] sm:$0xff]   ;;  %v2814_v18 = vld [vmem:[%s3478_s1 + $0x78] sm:$0xff]   ;;  %v2815_v19 = vld [vmem:[%s3478_s1 + $0x80] sm:$0xff]  }
  0x8c   :  { %v74_v36 = vmul.f32 1.442695, %v61_v32  ;;  %2835 = vpow2.f32 %v68_v33  ;;  %v60_v41 = vmul.f32 %v52_v38, %v44_v31  ;;  %v62_v42 = vmul.f32 %v54_v39, %v46_v34  ;;  %v2816_v20 = vld [vmem:[%s3478_s1 + $0x88] sm:$0xff]   ;;  %v2817_v21 = vld [vmem:[%s3478_s1 + $0x90] sm:$0xff]   ;;  %v2818_v22 = vld [vmem:[%s3478_s1 + $0x98] sm:$0xff]  }
  0x8d   :  { %2837 = vpow2.f32 %v70_v35  ;;  %v78_v44 = vmul.f32 1.442695, %v63_v40  ;;  %v2819_v23 = vld [vmem:[%s3478_s1 + $0xa0] sm:$0xff]   ;;  %v2820_v24 = vld [vmem:[%s3478_s1 + $0xa8] sm:$0xff]   ;;  %v2821_v25 = vld [vmem:[%s3478_s1 + $0xb0] sm:$0xff]  }
  0x8e   :  { %2839 = vpow2.f32 %v74_v36  ;;  %v72_v46 = vmul.f32 1.442695, %v60_v41  ;;  %v76_v49 = vmul.f32 1.442695, %v62_v42  ;;  %v2822_v34 = vld [vmem:[%s3478_s1 + $0xb8] sm:$0xff]  }
  0x8f   :  { %2841 = vpow2.f32 %v78_v44 }
  0x90   :  { %2843 = vpow2.f32 %v72_v46 }
  0x91   :  { %2845 = vpow2.f32 %v76_v49 }
  0x94   :  { %v2915_v43 = vpop.eup %2831 }
  0x95   :  { %v2917_v45 = vpop.eup %2833  ;;  %v208_v47 = vpack.c.bf16 %v2915_v43, %v2915_v43  ;;  %v80_v26 = vrot.slane %v2915_v43, 4 }
  0x96   :  { %v2921_v48 = vpop.eup %2835  ;;  %v209_v50 = vpack.c.bf16 %v2917_v45, %v2917_v45  ;;  %v86_v27 = vrot.slane %v2917_v45, 4 }
  0x97   :  { %v2925_v51 = vpop.eup %2837  ;;  %v347_v52 = vsel %vm345_vm0, %v208_v47, 0  ;;  %v210_v53 = vpack.c.bf16 %v2921_v48, %v2921_v48  ;;  %v92_v28 = vrot.slane %v2921_v48, 4  ;;  %v81_v30 = vadd.f32 %v2915_v43, %v80_v26  ;;  %v2823_v43 = vld [vmem:[%s3478_s1 + $0xc0] sm:$0xff]  }
  0x98   :  { %2454 = vmatprep.subr.msk.bf16.mxu0 %vm345_vm0, %v209_v50  ;;  %v211_v54 = vpack.c.bf16 %v2925_v51, %v2925_v51  ;;  %v2936_v56 = vpop.eup %2839  ;;  %v98_v29 = vrot.slane %v2925_v51, 4  ;;  %v87_v31 = vadd.f32 %v2917_v45, %v86_v27  ;;  %v2827_v27 = vld [vmem:[%s3478_s1 + $0xe0] sm:$0xff]  }
  0x99   :  { %359 = vmatpush1.bf16.msra.mxu0 %v347_v52  ;;  %v353_v57 = vsel %vm345_vm0, %v210_v53, 0  ;;  %v213_v58 = vpack.c.bf16 %v2936_v56, %v2936_v56  ;;  %v2950_v60 = vpop.eup %2841  ;;  %v93_v32 = vadd.f32 %v2921_v48, %v92_v28  ;;  %v82_v35 = vrot.slane %v81_v30, 2  ;;  %v2824_v52 = vld [vmem:[%s3478_s1 + $0xc8] sm:$0xff]  }
  0x9a   :  { %2471 = vmatprep.subr.msk.bf16.mxu1 %vm345_vm0, %v211_v54  ;;  %v2952_v61 = vpop.eup %2843  ;;  %v215_v63 = vpack.c.bf16 %v2950_v60, %v2950_v60  ;;  %v99_v33 = vadd.f32 %v2925_v51, %v98_v29  ;;  %v88_v36 = vrot.slane %v87_v31, 2 }
  0x9b   :  { %552 = vmatpush1.bf16.msra.mxu1 %v353_v57  ;;  %2504 = vmatprep.subr.msk.bf16.mxu0 %vm345_vm0, %v213_v58  ;;  %v2954_v62 = vpop.eup %2845  ;;  %v212_v0 = vpack.c.bf16 %v2952_v61, %v2952_v61  ;;  %v94_v37 = vrot.slane %v93_v32, 2  ;;  %v83_v39 = vadd.f32 %v82_v35, %v81_v30  ;;  %v2825_v58 = vld [vmem:[%s3478_s1 + $0xd0] sm:$0xff]  }
  0x9c   :  { %2455 = vmatmul.mubr.msk.bf16.vlgmr.msra.gmra.mrb[0].mxu0 %vm296_vm1, %v2799_v55  ;;  %2521 = vmatprep.subr.msk.bf16.mxu1 %vm345_vm0, %v215_v63  ;;  %v214_v2 = vpack.c.bf16 %v2954_v62, %v2954_v62  ;;  %v100_v38 = vrot.slane %v99_v33, 2  ;;  %v89_v40 = vadd.f32 %v88_v36, %v87_v31 }
  0x9d   :  { %400 = vmatprep.mubr.bf16.mxu0 %v2887_v1  ;;  %v873_v3 = vsel %vm345_vm0, %v212_v0, 0  ;;  %v95_v41 = vadd.f32 %v94_v37, %v93_v32  ;;  %v84_v44 = vrot.slane %v83_v39, 1 }
  0x9e   :  { %2472 = vmatmul.mubr.msk.bf16.vlgmr.msra.gmra.mrb[0].mxu1 %vm296_vm1, %v2799_v55  ;;  %885 = vmatpush1.bf16.msra.mxu0 %v873_v3  ;;  %v879_v5 = vsel %vm345_vm0, %v214_v2, 0  ;;  %v101_v42 = vadd.f32 %v100_v38, %v99_v33  ;;  %v90_v45 = vrot.slane %v89_v40, 1 }
  0x9f   :  { %593 = vmatprep.mubr.bf16.mxu1 %v2887_v1  ;;  %1078 = vmatpush1.bf16.msra.mxu1 %v879_v5  ;;  %v96_v46 = vrot.slane %v95_v41, 1  ;;  %v85_v48 = vadd.f32 %v84_v44, %v83_v39 }
  0xa0   :  { %v102_v47 = vrot.slane %v101_v42, 1  ;;  %v91_v49 = vadd.f32 %v90_v45, %v89_v40 }
  0xa1   :  { %v97_v50 = vadd.f32 %v96_v46, %v95_v41  ;;  %v128_v53 = vmax.f32 %v85_v48, 1e-06  ;;  %v2828_v48 = vld [vmem:[%s3478_s1 + $0xe8] sm:$0xff]  }
  0xa2   :  { %v103_v51 = vadd.f32 %v102_v47, %v101_v42  ;;  %v129_v54 = vmax.f32 %v91_v49, 1e-06 }
  0xa3   :  { %v130_v55 = vmax.f32 %v97_v50, 1e-06  ;;  %2847 = vrcp.f32 %v128_v53 }
  0xa4   :  { %2456 = vmatmul.mubr.msk.bf16.gmra.mrb[4].mxu0 %vm296_vm1, %v2800_v59  ;;  %v131_v57 = vmax.f32 %v103_v51, 1e-06  ;;  %2849 = vrcp.f32 %v129_v54 }
  0xa5   :  { %410 = vmatprep.mubr.bf16.mxu0 %v2887_v1  ;;  %2851 = vrcp.f32 %v130_v55 }
  0xa6   :  { %2473 = vmatmul.mubr.msk.bf16.gmra.mrb[4].mxu1 %vm296_vm1, %v2800_v59  ;;  %2853 = vrcp.f32 %v131_v57 }
  0xa7   :  { %603 = vmatprep.mubr.bf16.mxu1 %v2887_v1 }
  0xac   :  { %2457 = vmatmul.mubr.msk.bf16.gmra.mrb[8].mxu0 %vm296_vm1, %v2801_v4 }
  0xad   :  { %420 = vmatprep.mubr.bf16.mxu0 %v2887_v1  ;;  %v3151_v59 = vpop.eup %2847 }
  0xae   :  { %2474 = vmatmul.mubr.msk.bf16.gmra.mrb[8].mxu1 %vm296_vm1, %v2801_v4  ;;  %v3154_v0 = vpop.eup %2849  ;;  %v2826_v4 = vld [vmem:[%s3478_s1 + $0xd8] sm:$0xff]  }
  0xaf   :  { %613 = vmatprep.mubr.bf16.mxu1 %v2887_v1  ;;  %v3160_v5 = vpop.eup %2851 }
  0xb4   :  { %2458 = vmatmul.mubr.msk.bf16.gmra.mrb[12].mxu0 %vm296_vm1, %v2802_v6 }
  0xb5   :  { %430 = vmatprep.mubr.bf16.mxu0 %v2887_v1 }
  0xb6   :  { %2475 = vmatmul.mubr.msk.bf16.gmra.mrb[12].mxu1 %vm296_vm1, %v2802_v6 }
  0xb7   :  { %623 = vmatprep.mubr.bf16.mxu1 %v2887_v1 }
  0xbc   :  { %2459 = vmatmul.mubr.msk.bf16.gmra.mrb[16].mxu0 %vm296_vm1, %v2803_v7 }
  0xbd   :  { %440 = vmatprep.mubr.bf16.mxu0 %v2887_v1 }
  0xbe   :  { %2476 = vmatmul.mubr.msk.bf16.gmra.mrb[16].mxu1 %vm296_vm1, %v2803_v7 }
  0xbf   :  { %633 = vmatprep.mubr.bf16.mxu1 %v2887_v1 }
  0xc4   :  { %2460 = vmatmul.mubr.msk.bf16.gmra.mrb[20].mxu0 %vm296_vm1, %v2804_v8 }
  0xc5   :  { %450 = vmatprep.mubr.bf16.mxu0 %v2887_v1 }
  0xc6   :  { %2477 = vmatmul.mubr.msk.bf16.gmra.mrb[20].mxu1 %vm296_vm1, %v2804_v8 }
  0xc7   :  { %643 = vmatprep.mubr.bf16.mxu1 %v2887_v1 }
  0xcc   :  { %2461 = vmatmul.mubr.msk.bf16.gmra.mrb[24].mxu0 %vm296_vm1, %v2805_v9 }
  0xcd   :  { %460 = vmatprep.mubr.bf16.mxu0 %v2887_v1 }
  0xce   :  { %2478 = vmatmul.mubr.msk.bf16.gmra.mrb[24].mxu1 %vm296_vm1, %v2805_v9  ;;  %v3163_v9 = vpop.eup %2853 }
  0xcf   :  { %653 = vmatprep.mubr.bf16.mxu1 %v2887_v1 }
  0xd4   :  { %2462 = vmatmul.mubr.msk.bf16.gmra.mrb[28].mxu0 %vm296_vm1, %v2806_v10 }
  0xd5   :  { %470 = vmatprep.mubr.bf16.mxu0 %v2887_v1 }
  0xd6   :  { %2479 = vmatmul.mubr.msk.bf16.gmra.mrb[28].mxu1 %vm296_vm1, %v2806_v10 }
  0xd7   :  { %663 = vmatprep.mubr.bf16.mxu1 %v2887_v1 }
  0xdc   :  { %2463 = vmatmul.mubr.msk.bf16.gmra.mrb[32].mxu0 %vm296_vm1, %v2807_v11 }
  0xdd   :  { %480 = vmatprep.mubr.bf16.mxu0 %v2887_v1 }
  0xde   :  { %2480 = vmatmul.mubr.msk.bf16.gmra.mrb[32].mxu1 %vm296_vm1, %v2807_v11 }
  0xdf   :  { %673 = vmatprep.mubr.bf16.mxu1 %v2887_v1 }
  0xe4   :  { %2464 = vmatmul.mubr.msk.bf16.gmra.mrb[36].mxu0 %vm296_vm1, %v2808_v12 }
  0xe5   :  { %490 = vmatprep.mubr.bf16.mxu0 %v2887_v1 }
  0xe6   :  { %2481 = vmatmul.mubr.msk.bf16.gmra.mrb[36].mxu1 %vm296_vm1, %v2808_v12 }
  0xe7   :  { %683 = vmatprep.mubr.bf16.mxu1 %v2887_v1 }
  0xec   :  { %2465 = vmatmul.mubr.msk.bf16.gmra.mrb[40].mxu0 %vm296_vm1, %v2809_v13 }
  0xed   :  { %500 = vmatprep.mubr.bf16.mxu0 %v2887_v1 }
  0xee   :  { %2482 = vmatmul.mubr.msk.bf16.gmra.mrb[40].mxu1 %vm296_vm1, %v2809_v13 }
  0xef   :  { %693 = vmatprep.mubr.bf16.mxu1 %v2887_v1 }
  0xf4   :  { %2466 = vmatmul.mubr.msk.bf16.gmra.mrb[44].mxu0 %vm296_vm1, %v2810_v14 }
  0xf5   :  { %510 = vmatprep.mubr.bf16.mxu0 %v2887_v1 }
  0xf6   :  { %2483 = vmatmul.mubr.msk.bf16.gmra.mrb[44].mxu1 %vm296_vm1, %v2810_v14 }
  0xf7   :  { %703 = vmatprep.mubr.bf16.mxu1 %v2887_v1 }
  0xfc   :  { %2467 = vmatmul.mubr.msk.bf16.gmra.mrb[48].mxu0 %vm296_vm1, %v2811_v15 }
  0xfd   :  { %520 = vmatprep.mubr.bf16.mxu0 %v2887_v1 }
  0xfe   :  { %2484 = vmatmul.mubr.msk.bf16.gmra.mrb[48].mxu1 %vm296_vm1, %v2811_v15 }
  0xff   :  { %713 = vmatprep.mubr.bf16.mxu1 %v2887_v1 }
 0x104   :  { %2468 = vmatmul.mubr.msk.bf16.gmra.mrb[52].mxu0 %vm296_vm1, %v2812_v16 }
 0x105   :  { %530 = vmatprep.mubr.bf16.mxu0 %v2887_v1 }
 0x106   :  { %2485 = vmatmul.mubr.msk.bf16.gmra.mrb[52].mxu1 %vm296_vm1, %v2812_v16 }
 0x107   :  { %723 = vmatprep.mubr.bf16.mxu1 %v2887_v1 }
 0x10c   :  { %2469 = vmatmul.mubr.msk.bf16.gmra.mrb[56].mxu0 %vm296_vm1, %v2813_v17 }
 0x10d   :  { %540 = vmatprep.mubr.bf16.mxu0 %v2887_v1 }
 0x10e   :  { %2486 = vmatmul.mubr.msk.bf16.gmra.mrb[56].mxu1 %vm296_vm1, %v2813_v17 }
 0x10f   :  { %733 = vmatprep.mubr.bf16.mxu1 %v2887_v1 }
 0x114   :  { %2470 = vmatmul.mubr.msk.bf16.gmra.mrb[60].mxu0 %vm296_vm1, %v2814_v18 }
 0x115   :  { %916 = vmatprep.mubr.bf16.mxu0 %v2887_v1 }
 0x116   :  { %2487 = vmatmul.mubr.msk.bf16.gmra.mrb[60].mxu1 %vm296_vm1, %v2814_v18 }
 0x117   :  { %1109 = vmatprep.mubr.bf16.mxu1 %v2887_v1 }
 0x11c   :  { %2505 = vmatmul.mubr.msk.bf16.vlgmr.msra.gmra.mrb[64].mxu0 %vm296_vm1, %v2815_v19 }
 0x11d   :  { %926 = vmatprep.mubr.bf16.mxu0 %v2887_v1 }
 0x11e   :  { %2522 = vmatmul.mubr.msk.bf16.vlgmr.msra.gmra.mrb[64].mxu1 %vm296_vm1, %v2815_v19 }
 0x11f   :  { %1119 = vmatprep.mubr.bf16.mxu1 %v2887_v1 }
 0x124   :  { %2506 = vmatmul.mubr.msk.bf16.gmra.mrb[68].mxu0 %vm296_vm1, %v2816_v20 }
 0x125   :  { %936 = vmatprep.mubr.bf16.mxu0 %v2887_v1 }
 0x126   :  { %2523 = vmatmul.mubr.msk.bf16.gmra.mrb[68].mxu1 %vm296_vm1, %v2816_v20 }
 0x127   :  { %1129 = vmatprep.mubr.bf16.mxu1 %v2887_v1 }
 0x12c   :  { %2507 = vmatmul.mubr.msk.bf16.gmra.mrb[72].mxu0 %vm296_vm1, %v2817_v21 }
 0x12d   :  { %946 = vmatprep.mubr.bf16.mxu0 %v2887_v1 }
 0x12e   :  { %2524 = vmatmul.mubr.msk.bf16.gmra.mrb[72].mxu1 %vm296_vm1, %v2817_v21 }
 0x12f   :  { %1139 = vmatprep.mubr.bf16.mxu1 %v2887_v1 }
 0x134   :  { %2508 = vmatmul.mubr.msk.bf16.gmra.mrb[76].mxu0 %vm296_vm1, %v2818_v22 }
 0x135   :  { %956 = vmatprep.mubr.bf16.mxu0 %v2887_v1 }
 0x136   :  { %2525 = vmatmul.mubr.msk.bf16.gmra.mrb[76].mxu1 %vm296_vm1, %v2818_v22 }
 0x137   :  { %1149 = vmatprep.mubr.bf16.mxu1 %v2887_v1 }
 0x13c   :  { %2509 = vmatmul.mubr.msk.bf16.gmra.mrb[80].mxu0 %vm296_vm1, %v2819_v23 }
 0x13d   :  { %966 = vmatprep.mubr.bf16.mxu0 %v2887_v1 }
 0x13e   :  { %2526 = vmatmul.mubr.msk.bf16.gmra.mrb[80].mxu1 %vm296_vm1, %v2819_v23 }
 0x13f   :  { %1159 = vmatprep.mubr.bf16.mxu1 %v2887_v1 }
 0x144   :  { %2510 = vmatmul.mubr.msk.bf16.gmra.mrb[84].mxu0 %vm296_vm1, %v2820_v24 }
 0x145   :  { %976 = vmatprep.mubr.bf16.mxu0 %v2887_v1 }
 0x146   :  { %2527 = vmatmul.mubr.msk.bf16.gmra.mrb[84].mxu1 %vm296_vm1, %v2820_v24 }
 0x147   :  { %1169 = vmatprep.mubr.bf16.mxu1 %v2887_v1 }
 0x14c   :  { %2511 = vmatmul.mubr.msk.bf16.gmra.mrb[88].mxu0 %vm296_vm1, %v2821_v25 }
 0x14d   :  { %986 = vmatprep.mubr.bf16.mxu0 %v2887_v1 }
 0x14e   :  { %2528 = vmatmul.mubr.msk.bf16.gmra.mrb[88].mxu1 %vm296_vm1, %v2821_v25 }
 0x14f   :  { %1179 = vmatprep.mubr.bf16.mxu1 %v2887_v1 }
 0x154   :  { %2512 = vmatmul.mubr.msk.bf16.gmra.mrb[92].mxu0 %vm296_vm1, %v2822_v34 }
 0x155   :  { %996 = vmatprep.mubr.bf16.mxu0 %v2887_v1 }
 0x156   :  { %2529 = vmatmul.mubr.msk.bf16.gmra.mrb[92].mxu1 %vm296_vm1, %v2822_v34 }
 0x157   :  { %1189 = vmatprep.mubr.bf16.mxu1 %v2887_v1 }
 0x15c   :  { %2513 = vmatmul.mubr.msk.bf16.gmra.mrb[96].mxu0 %vm296_vm1, %v2823_v43 }
 0x15d   :  { %1006 = vmatprep.mubr.bf16.mxu0 %v2887_v1 }
 0x15e   :  { %2530 = vmatmul.mubr.msk.bf16.gmra.mrb[96].mxu1 %vm296_vm1, %v2823_v43 }
 0x15f   :  { %1199 = vmatprep.mubr.bf16.mxu1 %v2887_v1 }
 0x164   :  { %2514 = vmatmul.mubr.msk.bf16.gmra.mrb[100].mxu0 %vm296_vm1, %v2824_v52 }
 0x165   :  { %1016 = vmatprep.mubr.bf16.mxu0 %v2887_v1 }
 0x166   :  { %2531 = vmatmul.mubr.msk.bf16.gmra.mrb[100].mxu1 %vm296_vm1, %v2824_v52 }
 0x167   :  { %1209 = vmatprep.mubr.bf16.mxu1 %v2887_v1 }
 0x16c   :  { %2515 = vmatmul.mubr.msk.bf16.gmra.mrb[104].mxu0 %vm296_vm1, %v2825_v58 }
 0x16d   :  { %1026 = vmatprep.mubr.bf16.mxu0 %v2887_v1 }
 0x16e   :  { %2532 = vmatmul.mubr.msk.bf16.gmra.mrb[104].mxu1 %vm296_vm1, %v2825_v58 }
 0x16f   :  { %v392_v63 = vpop.f32.mrb[0].mxu0  ;;  %1219 = vmatprep.mubr.bf16.mxu1 %v2887_v1 }
 0x170   :  { %v1270_v2 = vmul.f32 %v3151_v59, %v392_v63  ;;  %v394_v3 = vpop.f32.mrb[1].mxu0 }
 0x171   :  { %v585_v6 = vpop.f32.mrb[0].mxu1  ;;  %v1271_v7 = vmul.f32 %v3154_v0, %v394_v3  ;;  %v396_v8 = vpop.f32.mrb[2].mxu0 }
 0x172   :  { %v1272_v10 = vmul.f32 %v3160_v5, %v585_v6  ;;  %v587_v11 = vpop.f32.mrb[1].mxu1  ;;  %v1274_v12 = vmul.f32 %v3151_v59, %v396_v8  ;;  %v398_v13 = vpop.f32.mrb[3].mxu0 }
 0x173   :  { %v2666_v14 = vpack.c.bf16 %v1271_v7, %v1270_v2  ;;  %v1273_v15 = vmul.f32 %v3163_v9, %v587_v11  ;;  %v589_v16 = vpop.f32.mrb[2].mxu1  ;;  %v1275_v17 = vmul.f32 %v3154_v0, %v398_v13 }
 0x174   :  { %v1276_v18 = vmul.f32 %v3160_v5, %v589_v16  ;;  %v591_v19 = vpop.f32.mrb[3].mxu1  ;;  %2516 = vmatmul.mubr.msk.bf16.gmra.mrb[108].mxu0 %vm296_vm1, %v2826_v4 }
 0x175   :  { %2294 = vst [vmem:[#allocation2] sm:$0xff] %v2666_v14  ;;  %v2667_v20 = vpack.c.bf16 %v1273_v15, %v1272_v10  ;;  %v2668_v21 = vpack.c.bf16 %v1275_v17, %v1274_v12  ;;  %v1277_v22 = vmul.f32 %v3163_v9, %v591_v19  ;;  %1036 = vmatprep.mubr.bf16.mxu0 %v2887_v1  ;;  %v2829_v14 = vld [vmem:[%s3478_s1 + $0xf0] sm:$0xff]  }
 0x176   :  { %2533 = vmatmul.mubr.msk.bf16.gmra.mrb[108].mxu1 %vm296_vm1, %v2826_v4 }
 0x177   :  { %2295 = vst [vmem:[#allocation2 + $0x8] sm:$0xff] %v2667_v20  ;;  %2296 = vst [vmem:[#allocation2 + $0x10] sm:$0xff] %v2668_v21  ;;  %v2669_v23 = vpack.c.bf16 %v1277_v22, %v1276_v18  ;;  %v402_v24 = vpop.f32.mrb[4].mxu0  ;;  %1229 = vmatprep.mubr.bf16.mxu1 %v2887_v1 }
 0x178   :  { %v1278_v25 = vmul.f32 %v3151_v59, %v402_v24  ;;  %v404_v26 = vpop.f32.mrb[5].mxu0 }
 0x179   :  { %2297 = vst [vmem:[#allocation2 + $0x18] sm:$0xff] %v2669_v23  ;;  %v595_v28 = vpop.f32.mrb[4].mxu1  ;;  %v1279_v29 = vmul.f32 %v3154_v0, %v404_v26  ;;  %v406_v30 = vpop.f32.mrb[6].mxu0 }
 0x17a   :  { %v1280_v31 = vmul.f32 %v3160_v5, %v595_v28  ;;  %v597_v32 = vpop.f32.mrb[5].mxu1  ;;  %v1282_v33 = vmul.f32 %v3151_v59, %v406_v30  ;;  %v408_v34 = vpop.f32.mrb[7].mxu0 }
 0x17b   :  { %v2670_v35 = vpack.c.bf16 %v1279_v29, %v1278_v25  ;;  %v1281_v36 = vmul.f32 %v3163_v9, %v597_v32  ;;  %v599_v37 = vpop.f32.mrb[6].mxu1  ;;  %v1283_v38 = vmul.f32 %v3154_v0, %v408_v34 }
 0x17c   :  { %v1284_v39 = vmul.f32 %v3160_v5, %v599_v37  ;;  %v601_v40 = vpop.f32.mrb[7].mxu1  ;;  %2517 = vmatmul.mubr.msk.bf16.gmra.mrb[112].mxu0 %vm296_vm1, %v2827_v27 }
 0x17d   :  { %2298 = vst [vmem:[#allocation2 + $0x20] sm:$0xff] %v2670_v35  ;;  %v2671_v41 = vpack.c.bf16 %v1281_v36, %v1280_v31  ;;  %v2672_v42 = vpack.c.bf16 %v1283_v38, %v1282_v33  ;;  %v1285_v43 = vmul.f32 %v3163_v9, %v601_v40  ;;  %1046 = vmatprep.mubr.bf16.mxu0 %v2887_v1  ;;  %v2830_v35 = vld [vmem:[%s3478_s1 + $0xf8] sm:$0xff]   ;;  %s2888_s1 = smov [#allocation2]  }
 0x17e   :  { %2534 = vmatmul.mubr.msk.bf16.gmra.mrb[112].mxu1 %vm296_vm1, %v2827_v27  ;;  %s2427_s18 = sshll.u32 %s2888_s1, 4  ;;  %s2428_s18 = int_to_ptr.vmem [resolvable:$true] %s2427_s18 }
 0x17f   :  { %2299 = vst [vmem:[#allocation2 + $0x28] sm:$0xff] %v2671_v41  ;;  %2300 = vst [vmem:[#allocation2 + $0x30] sm:$0xff] %v2672_v42  ;;  %v2673_v44 = vpack.c.bf16 %v1285_v43, %v1284_v39  ;;  %v412_v45 = vpop.f32.mrb[8].mxu0  ;;  %1239 = vmatprep.mubr.bf16.mxu1 %v2887_v1  ;;  %s2863_s19 = scalar_lea.vmem %s2428_s18, 16384  ;;  %p2868_p1 = scmp.lt.s32.totalorder %s2428_s18, %s2428_s18 }
 0x180   :  { %v1286_v46 = vmul.f32 %v3151_v59, %v412_v45  ;;  %v414_v47 = vpop.f32.mrb[9].mxu0  ;;  %p2864_p0 = scmp.ne.s32.totalorder %s2428_s18, %s2863_s19  ;;  %p2869_p2 = scmp.lt.s32.totalorder %s2863_s19, %s2863_s19 }
 0x181   :  { %2301 = vst [vmem:[#allocation2 + $0x38] sm:$0xff] %v2673_v44  ;;  %v605_v49 = vpop.f32.mrb[8].mxu1  ;;  %v1287_v50 = vmul.f32 %v3154_v0, %v414_v47  ;;  %v416_v51 = vpop.f32.mrb[10].mxu0 }
 0x182   :  { %v1288_v52 = vmul.f32 %v3160_v5, %v605_v49  ;;  %v607_v53 = vpop.f32.mrb[9].mxu1  ;;  %v1290_v54 = vmul.f32 %v3151_v59, %v416_v51  ;;  %v418_v55 = vpop.f32.mrb[11].mxu0  ;;  %p2870_p3 = por %p2869_p2, %p2868_p1 }
 0x183   :  { %v2674_v57 = vpack.c.bf16 %v1287_v50, %v1286_v46  ;;  %v1289_v58 = vmul.f32 %v3163_v9, %v607_v53  ;;  %v609_v63 = vpop.f32.mrb[10].mxu1  ;;  %v1291_v2 = vmul.f32 %v3154_v0, %v418_v55 }
 0x184   :  { %v1292_v3 = vmul.f32 %v3160_v5, %v609_v63  ;;  %v611_v4 = vpop.f32.mrb[11].mxu1  ;;  %2518 = vmatmul.mubr.msk.bf16.gmra.mrb[116].mxu0 %vm296_vm1, %v2828_v48  ;;  %p2871_p4 = pnand %p2870_p3, %p2864_p0 }
 0x185   :  { %2302 = vst [vmem:[#allocation2 + $0x40] sm:$0xff] %v2674_v57  ;;  %v2675_v6 = vpack.c.bf16 %v1289_v58, %v1288_v52  ;;  %v2676_v7 = vpack.c.bf16 %v1291_v2, %v1290_v54  ;;  %v1293_v8 = vmul.f32 %v3163_v9, %v611_v4  ;;  %1056 = vmatprep.mubr.bf16.mxu0 %v2887_v1 }
 0x186   :  { %2535 = vmatmul.mubr.msk.bf16.gmra.mrb[116].mxu1 %vm296_vm1, %v2828_v48 }
 0x187   :  { %2303 = vst [vmem:[#allocation2 + $0x48] sm:$0xff] %v2675_v6  ;;  %2304 = vst [vmem:[#allocation2 + $0x50] sm:$0xff] %v2676_v7  ;;  %v2677_v10 = vpack.c.bf16 %v1293_v8, %v1292_v3  ;;  %v422_v11 = vpop.f32.mrb[12].mxu0  ;;  %1249 = vmatprep.mubr.bf16.mxu1 %v2887_v1 }
 0x188   :  { %v1294_v12 = vmul.f32 %v3151_v59, %v422_v11  ;;  %v424_v13 = vpop.f32.mrb[13].mxu0 }
 0x189   :  { %2305 = vst [vmem:[#allocation2 + $0x58] sm:$0xff] %v2677_v10  ;;  %v615_v15 = vpop.f32.mrb[12].mxu1  ;;  %v1295_v16 = vmul.f32 %v3154_v0, %v424_v13  ;;  %v426_v17 = vpop.f32.mrb[14].mxu0 }
 0x18a   :  { %v1296_v18 = vmul.f32 %v3160_v5, %v615_v15  ;;  %v617_v19 = vpop.f32.mrb[13].mxu1  ;;  %v1298_v20 = vmul.f32 %v3151_v59, %v426_v17  ;;  %v428_v21 = vpop.f32.mrb[15].mxu0 }
 0x18b   :  { %v2678_v22 = vpack.c.bf16 %v1295_v16, %v1294_v12  ;;  %v1297_v23 = vmul.f32 %v3163_v9, %v617_v19  ;;  %v619_v24 = vpop.f32.mrb[14].mxu1  ;;  %v1299_v25 = vmul.f32 %v3154_v0, %v428_v21 }
 0x18c   :  { %v1300_v26 = vmul.f32 %v3160_v5, %v619_v24  ;;  %v621_v27 = vpop.f32.mrb[15].mxu1  ;;  %2519 = vmatmul.mubr.msk.bf16.gmra.mrb[120].mxu0 %vm296_vm1, %v2829_v14 }
 0x18d   :  { %2306 = vst [vmem:[#allocation2 + $0x60] sm:$0xff] %v2678_v22  ;;  %v2679_v28 = vpack.c.bf16 %v1297_v23, %v1296_v18  ;;  %v2680_v29 = vpack.c.bf16 %v1299_v25, %v1298_v20  ;;  %v1301_v30 = vmul.f32 %v3163_v9, %v621_v27  ;;  %1066 = vmatprep.mubr.bf16.mxu0 %v2887_v1 }
 0x18e   :  { %2536 = vmatmul.mubr.msk.bf16.gmra.mrb[120].mxu1 %vm296_vm1, %v2829_v14 }
 0x18f   :  { %2307 = vst [vmem:[#allocation2 + $0x68] sm:$0xff] %v2679_v28  ;;  %2308 = vst [vmem:[#allocation2 + $0x70] sm:$0xff] %v2680_v29  ;;  %v2681_v31 = vpack.c.bf16 %v1301_v30, %v1300_v26  ;;  %v432_v32 = vpop.f32.mrb[16].mxu0  ;;  %1259 = vmatprep.mubr.bf16.mxu1 %v2887_v1 }
 0x190   :  { %v1302_v33 = vmul.f32 %v3151_v59, %v432_v32  ;;  %v434_v34 = vpop.f32.mrb[17].mxu0 }
 0x191   :  { %2309 = vst [vmem:[#allocation2 + $0x78] sm:$0xff] %v2681_v31  ;;  %v625_v36 = vpop.f32.mrb[16].mxu1  ;;  %v1303_v37 = vmul.f32 %v3154_v0, %v434_v34  ;;  %v436_v38 = vpop.f32.mrb[18].mxu0 }
 0x192   :  { %v1304_v39 = vmul.f32 %v3160_v5, %v625_v36  ;;  %v627_v40 = vpop.f32.mrb[17].mxu1  ;;  %v1306_v41 = vmul.f32 %v3151_v59, %v436_v38  ;;  %v438_v42 = vpop.f32.mrb[19].mxu0 }
 0x193   :  { %v2682_v43 = vpack.c.bf16 %v1303_v37, %v1302_v33  ;;  %v1305_v1 = vmul.f32 %v3163_v9, %v627_v40  ;;  %v629_v44 = vpop.f32.mrb[18].mxu1  ;;  %v1307_v45 = vmul.f32 %v3154_v0, %v438_v42 }
 0x194   :  { %v1308_v46 = vmul.f32 %v3160_v5, %v629_v44  ;;  %v631_v47 = vpop.f32.mrb[19].mxu1  ;;  %2520 = vmatmul.mubr.msk.bf16.gmra.mrb[124].mxu0 %vm296_vm1, %v2830_v35 }
 0x195   :  { %2310 = vst [vmem:[#allocation2 + $0x80] sm:$0xff] %v2682_v43  ;;  %v2683_v48 = vpack.c.bf16 %v1305_v1, %v1304_v39  ;;  %v2684_v49 = vpack.c.bf16 %v1307_v45, %v1306_v41  ;;  %v1309_v50 = vmul.f32 %v3163_v9, %v631_v47 }
 0x196   :  { %2537 = vmatmul.mubr.msk.bf16.gmra.mrb[124].mxu1 %vm296_vm1, %v2830_v35 }
 0x197   :  { %2311 = vst [vmem:[#allocation2 + $0x88] sm:$0xff] %v2683_v48  ;;  %2312 = vst [vmem:[#allocation2 + $0x90] sm:$0xff] %v2684_v49  ;;  %v2685_v51 = vpack.c.bf16 %v1309_v50, %v1308_v46  ;;  %v442_v52 = vpop.f32.mrb[20].mxu0 }
 0x198   :  { %v1310_v53 = vmul.f32 %v3151_v59, %v442_v52  ;;  %v444_v54 = vpop.f32.mrb[21].mxu0 }
 0x199   :  { %2313 = vst [vmem:[#allocation2 + $0x98] sm:$0xff] %v2685_v51  ;;  %v635_v55 = vpop.f32.mrb[20].mxu1  ;;  %v1311_v57 = vmul.f32 %v3154_v0, %v444_v54  ;;  %v446_v58 = vpop.f32.mrb[22].mxu0 }
 0x19a   :  { %v1312_v63 = vmul.f32 %v3160_v5, %v635_v55  ;;  %v637_v2 = vpop.f32.mrb[21].mxu1  ;;  %v1314_v3 = vmul.f32 %v3151_v59, %v446_v58  ;;  %v448_v4 = vpop.f32.mrb[23].mxu0 }
 0x19b   :  { %v2686_v6 = vpack.c.bf16 %v1311_v57, %v1310_v53  ;;  %v1313_v7 = vmul.f32 %v3163_v9, %v637_v2  ;;  %v639_v8 = vpop.f32.mrb[22].mxu1  ;;  %v1315_v10 = vmul.f32 %v3154_v0, %v448_v4 }
 0x19c   :  { %v1316_v11 = vmul.f32 %v3160_v5, %v639_v8  ;;  %v641_v12 = vpop.f32.mrb[23].mxu1 }
 0x19d   :  { %2314 = vst [vmem:[#allocation2 + $0xa0] sm:$0xff] %v2686_v6  ;;  %v2687_v13 = vpack.c.bf16 %v1313_v7, %v1312_v63  ;;  %v2688_v14 = vpack.c.bf16 %v1315_v10, %v1314_v3  ;;  %v1317_v15 = vmul.f32 %v3163_v9, %v641_v12 }
 0x19f   :  { %2315 = vst [vmem:[#allocation2 + $0xa8] sm:$0xff] %v2687_v13  ;;  %2316 = vst [vmem:[#allocation2 + $0xb0] sm:$0xff] %v2688_v14  ;;  %v2689_v16 = vpack.c.bf16 %v1317_v15, %v1316_v11  ;;  %v452_v17 = vpop.f32.mrb[24].mxu0 }
 0x1a0   :  { %v1318_v18 = vmul.f32 %v3151_v59, %v452_v17  ;;  %v454_v19 = vpop.f32.mrb[25].mxu0 }
 0x1a1   :  { %2317 = vst [vmem:[#allocation2 + $0xb8] sm:$0xff] %v2689_v16  ;;  %v645_v20 = vpop.f32.mrb[24].mxu1  ;;  %v1319_v21 = vmul.f32 %v3154_v0, %v454_v19  ;;  %v456_v22 = vpop.f32.mrb[26].mxu0 }
 0x1a2   :  { %v1320_v23 = vmul.f32 %v3160_v5, %v645_v20  ;;  %v647_v24 = vpop.f32.mrb[25].mxu1  ;;  %v1322_v25 = vmul.f32 %v3151_v59, %v456_v22  ;;  %v458_v26 = vpop.f32.mrb[27].mxu0 }
 0x1a3   :  { %v2690_v27 = vpack.c.bf16 %v1319_v21, %v1318_v18  ;;  %v1321_v28 = vmul.f32 %v3163_v9, %v647_v24  ;;  %v649_v29 = vpop.f32.mrb[26].mxu1  ;;  %v1323_v30 = vmul.f32 %v3154_v0, %v458_v26 }
 0x1a4   :  { %v1324_v31 = vmul.f32 %v3160_v5, %v649_v29  ;;  %v651_v32 = vpop.f32.mrb[27].mxu1 }
 0x1a5   :  { %2318 = vst [vmem:[#allocation2 + $0xc0] sm:$0xff] %v2690_v27  ;;  %v2691_v33 = vpack.c.bf16 %v1321_v28, %v1320_v23  ;;  %v2692_v34 = vpack.c.bf16 %v1323_v30, %v1322_v25  ;;  %v1325_v35 = vmul.f32 %v3163_v9, %v651_v32 }
 0x1a7   :  { %2319 = vst [vmem:[#allocation2 + $0xc8] sm:$0xff] %v2691_v33  ;;  %2320 = vst [vmem:[#allocation2 + $0xd0] sm:$0xff] %v2692_v34  ;;  %v2693_v36 = vpack.c.bf16 %v1325_v35, %v1324_v31  ;;  %v462_v37 = vpop.f32.mrb[28].mxu0 }
 0x1a8   :  { %v1326_v38 = vmul.f32 %v3151_v59, %v462_v37  ;;  %v464_v39 = vpop.f32.mrb[29].mxu0 }
 0x1a9   :  { %2321 = vst [vmem:[#allocation2 + $0xd8] sm:$0xff] %v2693_v36  ;;  %v655_v40 = vpop.f32.mrb[28].mxu1  ;;  %v1327_v41 = vmul.f32 %v3154_v0, %v464_v39  ;;  %v466_v42 = vpop.f32.mrb[30].mxu0 }
 0x1aa   :  { %v1328_v43 = vmul.f32 %v3160_v5, %v655_v40  ;;  %v657_v1 = vpop.f32.mrb[29].mxu1  ;;  %v1330_v44 = vmul.f32 %v3151_v59, %v466_v42  ;;  %v468_v45 = vpop.f32.mrb[31].mxu0 }
 0x1ab   :  { %v2694_v46 = vpack.c.bf16 %v1327_v41, %v1326_v38  ;;  %v1329_v47 = vmul.f32 %v3163_v9, %v657_v1  ;;  %v659_v48 = vpop.f32.mrb[30].mxu1  ;;  %v1331_v49 = vmul.f32 %v3154_v0, %v468_v45 }
 0x1ac   :  { %v1332_v50 = vmul.f32 %v3160_v5, %v659_v48  ;;  %v661_v51 = vpop.f32.mrb[31].mxu1 }
 0x1ad   :  { %2322 = vst [vmem:[#allocation2 + $0xe0] sm:$0xff] %v2694_v46  ;;  %v2695_v52 = vpack.c.bf16 %v1329_v47, %v1328_v43  ;;  %v2696_v53 = vpack.c.bf16 %v1331_v49, %v1330_v44  ;;  %v1333_v54 = vmul.f32 %v3163_v9, %v661_v51 }
 0x1af   :  { %2323 = vst [vmem:[#allocation2 + $0xe8] sm:$0xff] %v2695_v52  ;;  %2324 = vst [vmem:[#allocation2 + $0xf0] sm:$0xff] %v2696_v53  ;;  %v2697_v55 = vpack.c.bf16 %v1333_v54, %v1332_v50  ;;  %v472_v57 = vpop.f32.mrb[32].mxu0 }
 0x1b0   :  { %v1334_v58 = vmul.f32 %v3151_v59, %v472_v57  ;;  %v474_v63 = vpop.f32.mrb[33].mxu0 }
 0x1b1   :  { %2325 = vst [vmem:[#allocation2 + $0xf8] sm:$0xff] %v2697_v55  ;;  %v665_v2 = vpop.f32.mrb[32].mxu1  ;;  %v1335_v3 = vmul.f32 %v3154_v0, %v474_v63  ;;  %v476_v4 = vpop.f32.mrb[34].mxu0 }
 0x1b2   :  { %v1336_v6 = vmul.f32 %v3160_v5, %v665_v2  ;;  %v667_v7 = vpop.f32.mrb[33].mxu1  ;;  %v1338_v8 = vmul.f32 %v3151_v59, %v476_v4  ;;  %v478_v10 = vpop.f32.mrb[35].mxu0 }
 0x1b3   :  { %v2698_v11 = vpack.c.bf16 %v1335_v3, %v1334_v58  ;;  %v1337_v12 = vmul.f32 %v3163_v9, %v667_v7  ;;  %v669_v13 = vpop.f32.mrb[34].mxu1  ;;  %v1339_v14 = vmul.f32 %v3154_v0, %v478_v10  ;;  %v104_v7 = vrot.slane %v2952_v61, 4 }
 0x1b4   :  { %v1340_v15 = vmul.f32 %v3160_v5, %v669_v13  ;;  %v671_v16 = vpop.f32.mrb[35].mxu1 }
 0x1b5   :  { %2326 = vst [vmem:[#allocation2 + $0x100] sm:$0xff] %v2698_v11  ;;  %v2699_v17 = vpack.c.bf16 %v1337_v12, %v1336_v6  ;;  %v2700_v18 = vpack.c.bf16 %v1339_v14, %v1338_v8  ;;  %v1341_v19 = vmul.f32 %v3163_v9, %v671_v16  ;;  %v110_v12 = vrot.slane %v2936_v56, 4 }
 0x1b7   :  { %2327 = vst [vmem:[#allocation2 + $0x108] sm:$0xff] %v2699_v17  ;;  %2328 = vst [vmem:[#allocation2 + $0x110] sm:$0xff] %v2700_v18  ;;  %v2701_v20 = vpack.c.bf16 %v1341_v19, %v1340_v15  ;;  %v482_v21 = vpop.f32.mrb[36].mxu0  ;;  %v116_v17 = vrot.slane %v2954_v62, 4 }
 0x1b8   :  { %v1342_v22 = vmul.f32 %v3151_v59, %v482_v21  ;;  %v484_v23 = vpop.f32.mrb[37].mxu0 }
 0x1b9   :  { %2329 = vst [vmem:[#allocation2 + $0x118] sm:$0xff] %v2701_v20  ;;  %v675_v24 = vpop.f32.mrb[36].mxu1  ;;  %v1343_v25 = vmul.f32 %v3154_v0, %v484_v23  ;;  %v486_v26 = vpop.f32.mrb[38].mxu0 }
 0x1ba   :  { %v1344_v27 = vmul.f32 %v3160_v5, %v675_v24  ;;  %v677_v28 = vpop.f32.mrb[37].mxu1  ;;  %v1346_v29 = vmul.f32 %v3151_v59, %v486_v26  ;;  %v488_v30 = vpop.f32.mrb[39].mxu0 }
 0x1bb   :  { %v2702_v31 = vpack.c.bf16 %v1343_v25, %v1342_v22  ;;  %v1345_v32 = vmul.f32 %v3163_v9, %v677_v28  ;;  %v679_v33 = vpop.f32.mrb[38].mxu1  ;;  %v1347_v34 = vmul.f32 %v3154_v0, %v488_v30  ;;  %v122_v22 = vrot.slane %v2950_v60, 4 }
 0x1bc   :  { %v1348_v35 = vmul.f32 %v3160_v5, %v679_v33  ;;  %v681_v36 = vpop.f32.mrb[39].mxu1  ;;  %v105_v25 = vadd.f32 %v2952_v61, %v104_v7  ;;  %v117_v30 = vadd.f32 %v2954_v62, %v116_v17 }
 0x1bd   :  { %2330 = vst [vmem:[#allocation2 + $0x120] sm:$0xff] %v2702_v31  ;;  %v2703_v37 = vpack.c.bf16 %v1345_v32, %v1344_v27  ;;  %v2704_v38 = vpack.c.bf16 %v1347_v34, %v1346_v29  ;;  %v1349_v39 = vmul.f32 %v3163_v9, %v681_v36  ;;  %v111_v29 = vadd.f32 %v2936_v56, %v110_v12 }
 0x1be   :  { %v123_v33 = vadd.f32 %v2950_v60, %v122_v22  ;;  %v106_v36 = vrot.slane %v105_v25, 2 }
 0x1bf   :  { %2331 = vst [vmem:[#allocation2 + $0x128] sm:$0xff] %v2703_v37  ;;  %2332 = vst [vmem:[#allocation2 + $0x130] sm:$0xff] %v2704_v38  ;;  %v2705_v40 = vpack.c.bf16 %v1349_v39, %v1348_v35  ;;  %v492_v41 = vpop.f32.mrb[40].mxu0  ;;  %v112_v39 = vrot.slane %v111_v29, 2 }
 0x1c0   :  { %v1350_v42 = vmul.f32 %v3151_v59, %v492_v41  ;;  %v494_v43 = vpop.f32.mrb[41].mxu0 }
 0x1c1   :  { %2333 = vst [vmem:[#allocation2 + $0x138] sm:$0xff] %v2705_v40  ;;  %v685_v1 = vpop.f32.mrb[40].mxu1  ;;  %v1351_v44 = vmul.f32 %v3154_v0, %v494_v43  ;;  %v496_v45 = vpop.f32.mrb[42].mxu0 }
 0x1c2   :  { %v1352_v46 = vmul.f32 %v3160_v5, %v685_v1  ;;  %v687_v47 = vpop.f32.mrb[41].mxu1  ;;  %v1354_v48 = vmul.f32 %v3151_v59, %v496_v45  ;;  %v498_v49 = vpop.f32.mrb[43].mxu0  ;;  %v124_v45 = vrot.slane %v123_v33, 2 }
 0x1c3   :  { %v2706_v50 = vpack.c.bf16 %v1351_v44, %v1350_v42  ;;  %v1353_v51 = vmul.f32 %v3163_v9, %v687_v47  ;;  %v689_v52 = vpop.f32.mrb[42].mxu1  ;;  %v1355_v53 = vmul.f32 %v3154_v0, %v498_v49  ;;  %v118_v42 = vrot.slane %v117_v30, 2 }
 0x1c4   :  { %v1356_v54 = vmul.f32 %v3160_v5, %v689_v52  ;;  %v691_v55 = vpop.f32.mrb[43].mxu1  ;;  %v113_v52 = vadd.f32 %v112_v39, %v111_v29 }
 0x1c5   :  { %2334 = vst [vmem:[#allocation2 + $0x140] sm:$0xff] %v2706_v50  ;;  %v2707_v57 = vpack.c.bf16 %v1353_v51, %v1352_v46  ;;  %v2708_v58 = vpack.c.bf16 %v1355_v53, %v1354_v48  ;;  %v1357_v63 = vmul.f32 %v3163_v9, %v691_v55  ;;  %v107_v48 = vadd.f32 %v106_v36, %v105_v25 }
 0x1c6   :  { %v119_v53 = vadd.f32 %v118_v42, %v117_v30  ;;  %v114_v7 = vrot.slane %v113_v52, 1 }
 0x1c7   :  { %2335 = vst [vmem:[#allocation2 + $0x148] sm:$0xff] %v2707_v57  ;;  %2336 = vst [vmem:[#allocation2 + $0x150] sm:$0xff] %v2708_v58  ;;  %v2709_v2 = vpack.c.bf16 %v1357_v63, %v1356_v54  ;;  %v502_v3 = vpop.f32.mrb[44].mxu0  ;;  %v125_v57 = vadd.f32 %v124_v45, %v123_v33 }
 0x1c8   :  { %v1358_v4 = vmul.f32 %v3151_v59, %v502_v3  ;;  %v504_v6 = vpop.f32.mrb[45].mxu0  ;;  %v115_v25 = vadd.f32 %v114_v7, %v113_v52 }
 0x1c9   :  { %2337 = vst [vmem:[#allocation2 + $0x158] sm:$0xff] %v2709_v2  ;;  %v695_v8 = vpop.f32.mrb[44].mxu1  ;;  %v1359_v10 = vmul.f32 %v3154_v0, %v504_v6  ;;  %v506_v11 = vpop.f32.mrb[46].mxu0  ;;  %v108_v2 = vrot.slane %v107_v48, 1 }
 0x1ca   :  { %v1360_v13 = vmul.f32 %v3160_v5, %v695_v8  ;;  %v697_v14 = vpop.f32.mrb[45].mxu1  ;;  %v1362_v15 = vmul.f32 %v3151_v59, %v506_v11  ;;  %v508_v16 = vpop.f32.mrb[47].mxu0  ;;  %v133_v36 = vmax.f32 %v115_v25, 1e-06 }
 0x1cb   :  { %v2710_v18 = vpack.c.bf16 %v1359_v10, %v1358_v4  ;;  %v1361_v19 = vmul.f32 %v3163_v9, %v697_v14  ;;  %v699_v20 = vpop.f32.mrb[46].mxu1  ;;  %v1363_v21 = vmul.f32 %v3154_v0, %v508_v16 }
 0x1cc   :  { %v1364_v23 = vmul.f32 %v3160_v5, %v699_v20  ;;  %v701_v24 = vpop.f32.mrb[47].mxu1 }
 0x1cd   :  { %2338 = vst [vmem:[#allocation2 + $0x160] sm:$0xff] %v2710_v18  ;;  %v2711_v26 = vpack.c.bf16 %v1361_v19, %v1360_v13  ;;  %v2712_v27 = vpack.c.bf16 %v1363_v21, %v1362_v15  ;;  %v1365_v28 = vmul.f32 %v3163_v9, %v701_v24  ;;  %v120_v13 = vrot.slane %v119_v53, 1 }
 0x1ce   :  { %v126_v18 = vrot.slane %v125_v57, 1  ;;  %v109_v21 = vadd.f32 %v108_v2, %v107_v48 }
 0x1cf   :  { %2339 = vst [vmem:[#allocation2 + $0x168] sm:$0xff] %v2711_v26  ;;  %2340 = vst [vmem:[#allocation2 + $0x170] sm:$0xff] %v2712_v27  ;;  %v2713_v31 = vpack.c.bf16 %v1365_v28, %v1364_v23  ;;  %v512_v32 = vpop.f32.mrb[48].mxu0  ;;  %v121_v26 = vadd.f32 %v120_v13, %v119_v53 }
 0x1d0   :  { %v1366_v34 = vmul.f32 %v3151_v59, %v512_v32  ;;  %v514_v35 = vpop.f32.mrb[49].mxu0  ;;  %v127_v29 = vadd.f32 %v126_v18, %v125_v57  ;;  %v132_v32 = vmax.f32 %v109_v21, 1e-06 }
 0x1d1   :  { %2341 = vst [vmem:[#allocation2 + $0x178] sm:$0xff] %v2713_v31  ;;  %v705_v61 = vpop.f32.mrb[48].mxu1  ;;  %v1367_v37 = vmul.f32 %v3154_v0, %v514_v35  ;;  %v516_v38 = vpop.f32.mrb[50].mxu0 }
 0x1d2   :  { %v1368_v56 = vmul.f32 %v3160_v5, %v705_v61  ;;  %v707_v40 = vpop.f32.mrb[49].mxu1  ;;  %v1370_v62 = vmul.f32 %v3151_v59, %v516_v38  ;;  %v518_v41 = vpop.f32.mrb[51].mxu0  ;;  %2855 = vrcp.f32 %v132_v32 }
 0x1d3   :  { %v2714_v43 = vpack.c.bf16 %v1367_v37, %v1366_v34  ;;  %v1369_v60 = vmul.f32 %v3163_v9, %v707_v40  ;;  %v709_v1 = vpop.f32.mrb[50].mxu1  ;;  %v1371_v44 = vmul.f32 %v3154_v0, %v518_v41  ;;  %2857 = vrcp.f32 %v133_v36 }
 0x1d4   :  { %v1372_v46 = vmul.f32 %v3160_v5, %v709_v1  ;;  %v711_v47 = vpop.f32.mrb[51].mxu1 }
 0x1d5   :  { %2342 = vst [vmem:[#allocation2 + $0x180] sm:$0xff] %v2714_v43  ;;  %v2715_v49 = vpack.c.bf16 %v1369_v60, %v1368_v56  ;;  %v2716_v50 = vpack.c.bf16 %v1371_v44, %v1370_v62  ;;  %v1373_v51 = vmul.f32 %v3163_v9, %v711_v47  ;;  %v134_v56 = vmax.f32 %v121_v26, 1e-06 }
 0x1d6   :  { %v135_v43 = vmax.f32 %v127_v29, 1e-06 }
 0x1d7   :  { %2343 = vst [vmem:[#allocation2 + $0x188] sm:$0xff] %v2715_v49  ;;  %2344 = vst [vmem:[#allocation2 + $0x190] sm:$0xff] %v2716_v50  ;;  %v2717_v54 = vpack.c.bf16 %v1373_v51, %v1372_v46  ;;  %v522_v55 = vpop.f32.mrb[52].mxu0  ;;  %2859 = vrcp.f32 %v134_v56 }
 0x1d8   :  { %v1374_v58 = vmul.f32 %v3151_v59, %v522_v55  ;;  %v524_v63 = vpop.f32.mrb[53].mxu0  ;;  %2861 = vrcp.f32 %v135_v43 }
 0x1d9   :  { %2345 = vst [vmem:[#allocation2 + $0x198] sm:$0xff] %v2717_v54  ;;  %v715_v3 = vpop.f32.mrb[52].mxu1  ;;  %v1375_v4 = vmul.f32 %v3154_v0, %v524_v63  ;;  %v526_v6 = vpop.f32.mrb[54].mxu0 }
 0x1da   :  { %v1376_v8 = vmul.f32 %v3160_v5, %v715_v3  ;;  %v717_v10 = vpop.f32.mrb[53].mxu1  ;;  %v1378_v11 = vmul.f32 %v3151_v59, %v526_v6  ;;  %v528_v12 = vpop.f32.mrb[55].mxu0 }
 0x1db   :  { %v2718_v14 = vpack.c.bf16 %v1375_v4, %v1374_v58  ;;  %v1377_v15 = vmul.f32 %v3163_v9, %v717_v10  ;;  %v719_v16 = vpop.f32.mrb[54].mxu1  ;;  %v1379_v17 = vmul.f32 %v3154_v0, %v528_v12 }
 0x1dc   :  { %v1380_v19 = vmul.f32 %v3160_v5, %v719_v16  ;;  %v721_v20 = vpop.f32.mrb[55].mxu1  ;;  %v3329_v12 = vpop.eup %2855 }
 0x1dd   :  { %2346 = vst [vmem:[#allocation2 + $0x1a0] sm:$0xff] %v2718_v14  ;;  %v2719_v22 = vpack.c.bf16 %v1377_v15, %v1376_v8  ;;  %v2720_v23 = vpack.c.bf16 %v1379_v17, %v1378_v11  ;;  %v1381_v24 = vmul.f32 %v3163_v9, %v721_v20  ;;  %v3331_v14 = vpop.eup %2857 }
 0x1df   :  { %2347 = vst [vmem:[#allocation2 + $0x1a8] sm:$0xff] %v2719_v22  ;;  %2348 = vst [vmem:[#allocation2 + $0x1b0] sm:$0xff] %v2720_v23  ;;  %v2721_v27 = vpack.c.bf16 %v1381_v24, %v1380_v19  ;;  %v532_v28 = vpop.f32.mrb[56].mxu0 }
 0x1e0   :  { %v1382_v30 = vmul.f32 %v3151_v59, %v532_v28  ;;  %v534_v31 = vpop.f32.mrb[57].mxu0 }
 0x1e1   :  { %2349 = vst [vmem:[#allocation2 + $0x1b8] sm:$0xff] %v2721_v27  ;;  %v725_v33 = vpop.f32.mrb[56].mxu1  ;;  %v1383_v34 = vmul.f32 %v3154_v0, %v534_v31  ;;  %v536_v35 = vpop.f32.mrb[58].mxu0 }
 0x1e2   :  { %v1384_v61 = vmul.f32 %v3160_v5, %v725_v33  ;;  %v727_v37 = vpop.f32.mrb[57].mxu1  ;;  %v1386_v38 = vmul.f32 %v3151_v59, %v536_v35  ;;  %v538_v39 = vpop.f32.mrb[59].mxu0 }
 0x1e3   :  { %v2722_v40 = vpack.c.bf16 %v1383_v34, %v1382_v30  ;;  %v1385_v62 = vmul.f32 %v3163_v9, %v727_v37  ;;  %v729_v41 = vpop.f32.mrb[58].mxu1  ;;  %v1387_v42 = vmul.f32 %v3154_v0, %v538_v39 }
 0x1e4   :  { %v1388_v60 = vmul.f32 %v3160_v5, %v729_v41  ;;  %v731_v1 = vpop.f32.mrb[59].mxu1 }
 0x1e5   :  { %2350 = vst [vmem:[#allocation2 + $0x1c0] sm:$0xff] %v2722_v40  ;;  %v2723_v44 = vpack.c.bf16 %v1385_v62, %v1384_v61  ;;  %v2724_v45 = vpack.c.bf16 %v1387_v42, %v1386_v38  ;;  %v1389_v46 = vmul.f32 %v3163_v9, %v731_v1 }
 0x1e7   :  { %2351 = vst [vmem:[#allocation2 + $0x1c8] sm:$0xff] %v2723_v44  ;;  %2352 = vst [vmem:[#allocation2 + $0x1d0] sm:$0xff] %v2724_v45  ;;  %v2725_v47 = vpack.c.bf16 %v1389_v46, %v1388_v60  ;;  %v542_v48 = vpop.f32.mrb[60].mxu0 }
 0x1e8   :  { %v1390_v49 = vmul.f32 %v3151_v59, %v542_v48  ;;  %v544_v50 = vpop.f32.mrb[61].mxu0 }
 0x1e9   :  { %2353 = vst [vmem:[#allocation2 + $0x1d8] sm:$0xff] %v2725_v47  ;;  %v735_v51 = vpop.f32.mrb[60].mxu1  ;;  %v1391_v52 = vmul.f32 %v3154_v0, %v544_v50  ;;  %v546_v53 = vpop.f32.mrb[62].mxu0 }
 0x1ea   :  { %v1392_v54 = vmul.f32 %v3160_v5, %v735_v51  ;;  %v737_v55 = vpop.f32.mrb[61].mxu1  ;;  %v1394_v57 = vmul.f32 %v3151_v59, %v546_v53  ;;  %v548_v58 = vpop.f32.mrb[63].mxu0 }
 0x1eb   :  { %v2726_v63 = vpack.c.bf16 %v1391_v52, %v1390_v49  ;;  %v1393_v2 = vmul.f32 %v3163_v9, %v737_v55  ;;  %v739_v3 = vpop.f32.mrb[62].mxu1  ;;  %v1395_v4 = vmul.f32 %v3154_v0, %v548_v58  ;;  %v3334_v0 = vpop.eup %2859 }
 0x1ec   :  { %v1396_v6 = vmul.f32 %v3160_v5, %v739_v3  ;;  %v741_v7 = vpop.f32.mrb[63].mxu1  ;;  %v3337_v19 = vpop.eup %2861 }
 0x1ed   :  { %2354 = vst [vmem:[#allocation2 + $0x1e0] sm:$0xff] %v2726_v63  ;;  %v2727_v8 = vpack.c.bf16 %v1393_v2, %v1392_v54  ;;  %v2728_v10 = vpack.c.bf16 %v1395_v4, %v1394_v57  ;;  %v1397_v11 = vmul.f32 %v3163_v9, %v741_v7 }
 0x1ef   :  { %2355 = vst [vmem:[#allocation2 + $0x1e8] sm:$0xff] %v2727_v8  ;;  %2356 = vst [vmem:[#allocation2 + $0x1f0] sm:$0xff] %v2728_v10  ;;  %v2729_v59 = vpack.c.bf16 %v1397_v11, %v1396_v6  ;;  %v918_v13 = vpop.f32.mrb[64].mxu0 }
 0x1f0   :  { %v1398_v15 = vmul.f32 %v3329_v12, %v918_v13  ;;  %v920_v16 = vpop.f32.mrb[65].mxu0 }
 0x1f1   :  { %2357 = vst [vmem:[#allocation2 + $0x1f8] sm:$0xff] %v2729_v59  ;;  %v1111_v5 = vpop.f32.mrb[64].mxu1  ;;  %v1399_v17 = vmul.f32 %v3331_v14, %v920_v16  ;;  %v922_v18 = vpop.f32.mrb[66].mxu0 }
 0x1f2   :  { %v1400_v9 = vmul.f32 %v3334_v0, %v1111_v5  ;;  %v1113_v20 = vpop.f32.mrb[65].mxu1  ;;  %v1402_v21 = vmul.f32 %v3329_v12, %v922_v18  ;;  %v924_v22 = vpop.f32.mrb[67].mxu0 }
 0x1f3   :  { %v2730_v23 = vpack.c.bf16 %v1399_v17, %v1398_v15  ;;  %v1401_v24 = vmul.f32 %v3337_v19, %v1113_v20  ;;  %v1115_v25 = vpop.f32.mrb[66].mxu1  ;;  %v1403_v26 = vmul.f32 %v3331_v14, %v924_v22 }
 0x1f4   :  { %v1404_v27 = vmul.f32 %v3334_v0, %v1115_v25  ;;  %v1117_v28 = vpop.f32.mrb[67].mxu1 }
 0x1f5   :  { %2358 = vst [vmem:[#allocation2 + $0x200] sm:$0xff] %v2730_v23  ;;  %v2731_v29 = vpack.c.bf16 %v1401_v24, %v1400_v9  ;;  %v2732_v30 = vpack.c.bf16 %v1403_v26, %v1402_v21  ;;  %v1405_v31 = vmul.f32 %v3337_v19, %v1117_v28 }
 0x1f7   :  { %2359 = vst [vmem:[#allocation2 + $0x208] sm:$0xff] %v2731_v29  ;;  %2360 = vst [vmem:[#allocation2 + $0x210] sm:$0xff] %v2732_v30  ;;  %v2733_v32 = vpack.c.bf16 %v1405_v31, %v1404_v27  ;;  %v928_v33 = vpop.f32.mrb[68].mxu0 }
 0x1f8   :  { %v1406_v34 = vmul.f32 %v3329_v12, %v928_v33  ;;  %v930_v35 = vpop.f32.mrb[69].mxu0 }
 0x1f9   :  { %2361 = vst [vmem:[#allocation2 + $0x218] sm:$0xff] %v2733_v32  ;;  %v1121_v36 = vpop.f32.mrb[68].mxu1  ;;  %v1407_v61 = vmul.f32 %v3331_v14, %v930_v35  ;;  %v932_v37 = vpop.f32.mrb[70].mxu0 }
 0x1fa   :  { %v1408_v38 = vmul.f32 %v3334_v0, %v1121_v36  ;;  %v1123_v39 = vpop.f32.mrb[69].mxu1  ;;  %v1410_v56 = vmul.f32 %v3329_v12, %v932_v37  ;;  %v934_v40 = vpop.f32.mrb[71].mxu0 }
 0x1fb   :  { %v2734_v62 = vpack.c.bf16 %v1407_v61, %v1406_v34  ;;  %v1409_v41 = vmul.f32 %v3337_v19, %v1123_v39  ;;  %v1125_v42 = vpop.f32.mrb[70].mxu1  ;;  %v1411_v43 = vmul.f32 %v3331_v14, %v934_v40 }
 0x1fc   :  { %v1412_v60 = vmul.f32 %v3334_v0, %v1125_v42  ;;  %v1127_v1 = vpop.f32.mrb[71].mxu1 }
 0x1fd   :  { %2362 = vst [vmem:[#allocation2 + $0x220] sm:$0xff] %v2734_v62  ;;  %v2735_v44 = vpack.c.bf16 %v1409_v41, %v1408_v38  ;;  %v2736_v45 = vpack.c.bf16 %v1411_v43, %v1410_v56  ;;  %v1413_v46 = vmul.f32 %v3337_v19, %v1127_v1 }
 0x1ff   :  { %2363 = vst [vmem:[#allocation2 + $0x228] sm:$0xff] %v2735_v44  ;;  %2364 = vst [vmem:[#allocation2 + $0x230] sm:$0xff] %v2736_v45  ;;  %v2737_v47 = vpack.c.bf16 %v1413_v46, %v1412_v60  ;;  %v938_v48 = vpop.f32.mrb[72].mxu0 }
 0x200   :  { %v1414_v49 = vmul.f32 %v3329_v12, %v938_v48  ;;  %v940_v50 = vpop.f32.mrb[73].mxu0 }
 0x201   :  { %2365 = vst [vmem:[#allocation2 + $0x238] sm:$0xff] %v2737_v47  ;;  %v1131_v51 = vpop.f32.mrb[72].mxu1  ;;  %v1415_v52 = vmul.f32 %v3331_v14, %v940_v50  ;;  %v942_v53 = vpop.f32.mrb[74].mxu0 }
 0x202   :  { %v1416_v54 = vmul.f32 %v3334_v0, %v1131_v51  ;;  %v1133_v55 = vpop.f32.mrb[73].mxu1  ;;  %v1418_v57 = vmul.f32 %v3329_v12, %v942_v53  ;;  %v944_v58 = vpop.f32.mrb[75].mxu0 }
 0x203   :  { %v2738_v63 = vpack.c.bf16 %v1415_v52, %v1414_v49  ;;  %v1417_v2 = vmul.f32 %v3337_v19, %v1133_v55  ;;  %v1135_v3 = vpop.f32.mrb[74].mxu1  ;;  %v1419_v4 = vmul.f32 %v3331_v14, %v944_v58 }
 0x204   :  { %v1420_v6 = vmul.f32 %v3334_v0, %v1135_v3  ;;  %v1137_v7 = vpop.f32.mrb[75].mxu1 }
 0x205   :  { %2366 = vst [vmem:[#allocation2 + $0x240] sm:$0xff] %v2738_v63  ;;  %v2739_v8 = vpack.c.bf16 %v1417_v2, %v1416_v54  ;;  %v2740_v10 = vpack.c.bf16 %v1419_v4, %v1418_v57  ;;  %v1421_v11 = vmul.f32 %v3337_v19, %v1137_v7 }
 0x207   :  { %2367 = vst [vmem:[#allocation2 + $0x248] sm:$0xff] %v2739_v8  ;;  %2368 = vst [vmem:[#allocation2 + $0x250] sm:$0xff] %v2740_v10  ;;  %v2741_v59 = vpack.c.bf16 %v1421_v11, %v1420_v6  ;;  %v948_v13 = vpop.f32.mrb[76].mxu0 }
 0x208   :  { %v1422_v15 = vmul.f32 %v3329_v12, %v948_v13  ;;  %v950_v16 = vpop.f32.mrb[77].mxu0 }
 0x209   :  { %2369 = vst [vmem:[#allocation2 + $0x258] sm:$0xff] %v2741_v59  ;;  %v1141_v5 = vpop.f32.mrb[76].mxu1  ;;  %v1423_v17 = vmul.f32 %v3331_v14, %v950_v16  ;;  %v952_v18 = vpop.f32.mrb[78].mxu0 }
 0x20a   :  { %v1424_v9 = vmul.f32 %v3334_v0, %v1141_v5  ;;  %v1143_v20 = vpop.f32.mrb[77].mxu1  ;;  %v1426_v21 = vmul.f32 %v3329_v12, %v952_v18  ;;  %v954_v22 = vpop.f32.mrb[79].mxu0 }
 0x20b   :  { %v2742_v23 = vpack.c.bf16 %v1423_v17, %v1422_v15  ;;  %v1425_v24 = vmul.f32 %v3337_v19, %v1143_v20  ;;  %v1145_v25 = vpop.f32.mrb[78].mxu1  ;;  %v1427_v26 = vmul.f32 %v3331_v14, %v954_v22 }
 0x20c   :  { %v1428_v27 = vmul.f32 %v3334_v0, %v1145_v25  ;;  %v1147_v28 = vpop.f32.mrb[79].mxu1 }
 0x20d   :  { %2370 = vst [vmem:[#allocation2 + $0x260] sm:$0xff] %v2742_v23  ;;  %v2743_v29 = vpack.c.bf16 %v1425_v24, %v1424_v9  ;;  %v2744_v30 = vpack.c.bf16 %v1427_v26, %v1426_v21  ;;  %v1429_v31 = vmul.f32 %v3337_v19, %v1147_v28 }
 0x20f   :  { %2371 = vst [vmem:[#allocation2 + $0x268] sm:$0xff] %v2743_v29  ;;  %2372 = vst [vmem:[#allocation2 + $0x270] sm:$0xff] %v2744_v30  ;;  %v2745_v32 = vpack.c.bf16 %v1429_v31, %v1428_v27  ;;  %v958_v33 = vpop.f32.mrb[80].mxu0 }
 0x210   :  { %v1430_v34 = vmul.f32 %v3329_v12, %v958_v33  ;;  %v960_v35 = vpop.f32.mrb[81].mxu0 }
 0x211   :  { %2373 = vst [vmem:[#allocation2 + $0x278] sm:$0xff] %v2745_v32  ;;  %v1151_v36 = vpop.f32.mrb[80].mxu1  ;;  %v1431_v61 = vmul.f32 %v3331_v14, %v960_v35  ;;  %v962_v37 = vpop.f32.mrb[82].mxu0 }
 0x212   :  { %v1432_v38 = vmul.f32 %v3334_v0, %v1151_v36  ;;  %v1153_v39 = vpop.f32.mrb[81].mxu1  ;;  %v1434_v56 = vmul.f32 %v3329_v12, %v962_v37  ;;  %v964_v40 = vpop.f32.mrb[83].mxu0 }
 0x213   :  { %v2746_v62 = vpack.c.bf16 %v1431_v61, %v1430_v34  ;;  %v1433_v41 = vmul.f32 %v3337_v19, %v1153_v39  ;;  %v1155_v42 = vpop.f32.mrb[82].mxu1  ;;  %v1435_v43 = vmul.f32 %v3331_v14, %v964_v40 }
 0x214   :  { %v1436_v60 = vmul.f32 %v3334_v0, %v1155_v42  ;;  %v1157_v1 = vpop.f32.mrb[83].mxu1 }
 0x215   :  { %2374 = vst [vmem:[#allocation2 + $0x280] sm:$0xff] %v2746_v62  ;;  %v2747_v44 = vpack.c.bf16 %v1433_v41, %v1432_v38  ;;  %v2748_v45 = vpack.c.bf16 %v1435_v43, %v1434_v56  ;;  %v1437_v46 = vmul.f32 %v3337_v19, %v1157_v1 }
 0x217   :  { %2375 = vst [vmem:[#allocation2 + $0x288] sm:$0xff] %v2747_v44  ;;  %2376 = vst [vmem:[#allocation2 + $0x290] sm:$0xff] %v2748_v45  ;;  %v2749_v47 = vpack.c.bf16 %v1437_v46, %v1436_v60  ;;  %v968_v48 = vpop.f32.mrb[84].mxu0 }
 0x218   :  { %v1438_v49 = vmul.f32 %v3329_v12, %v968_v48  ;;  %v970_v50 = vpop.f32.mrb[85].mxu0 }
 0x219   :  { %2377 = vst [vmem:[#allocation2 + $0x298] sm:$0xff] %v2749_v47  ;;  %v1161_v51 = vpop.f32.mrb[84].mxu1  ;;  %v1439_v52 = vmul.f32 %v3331_v14, %v970_v50  ;;  %v972_v53 = vpop.f32.mrb[86].mxu0 }
 0x21a   :  { %v1440_v54 = vmul.f32 %v3334_v0, %v1161_v51  ;;  %v1163_v55 = vpop.f32.mrb[85].mxu1  ;;  %v1442_v57 = vmul.f32 %v3329_v12, %v972_v53  ;;  %v974_v58 = vpop.f32.mrb[87].mxu0 }
 0x21b   :  { %v2750_v63 = vpack.c.bf16 %v1439_v52, %v1438_v49  ;;  %v1441_v2 = vmul.f32 %v3337_v19, %v1163_v55  ;;  %v1165_v3 = vpop.f32.mrb[86].mxu1  ;;  %v1443_v4 = vmul.f32 %v3331_v14, %v974_v58 }
 0x21c   :  { %v1444_v6 = vmul.f32 %v3334_v0, %v1165_v3  ;;  %v1167_v7 = vpop.f32.mrb[87].mxu1 }
 0x21d   :  { %2378 = vst [vmem:[#allocation2 + $0x2a0] sm:$0xff] %v2750_v63  ;;  %v2751_v8 = vpack.c.bf16 %v1441_v2, %v1440_v54  ;;  %v2752_v10 = vpack.c.bf16 %v1443_v4, %v1442_v57  ;;  %v1445_v11 = vmul.f32 %v3337_v19, %v1167_v7 }
 0x21f   :  { %2379 = vst [vmem:[#allocation2 + $0x2a8] sm:$0xff] %v2751_v8  ;;  %2380 = vst [vmem:[#allocation2 + $0x2b0] sm:$0xff] %v2752_v10  ;;  %v2753_v59 = vpack.c.bf16 %v1445_v11, %v1444_v6  ;;  %v978_v13 = vpop.f32.mrb[88].mxu0 }
 0x220   :  { %v1446_v15 = vmul.f32 %v3329_v12, %v978_v13  ;;  %v980_v16 = vpop.f32.mrb[89].mxu0 }
 0x221   :  { %2381 = vst [vmem:[#allocation2 + $0x2b8] sm:$0xff] %v2753_v59  ;;  %v1171_v5 = vpop.f32.mrb[88].mxu1  ;;  %v1447_v17 = vmul.f32 %v3331_v14, %v980_v16  ;;  %v982_v18 = vpop.f32.mrb[90].mxu0 }
 0x222   :  { %v1448_v9 = vmul.f32 %v3334_v0, %v1171_v5  ;;  %v1173_v20 = vpop.f32.mrb[89].mxu1  ;;  %v1450_v21 = vmul.f32 %v3329_v12, %v982_v18  ;;  %v984_v22 = vpop.f32.mrb[91].mxu0 }
 0x223   :  { %v2754_v23 = vpack.c.bf16 %v1447_v17, %v1446_v15  ;;  %v1449_v24 = vmul.f32 %v3337_v19, %v1173_v20  ;;  %v1175_v25 = vpop.f32.mrb[90].mxu1  ;;  %v1451_v26 = vmul.f32 %v3331_v14, %v984_v22 }
 0x224   :  { %v1452_v27 = vmul.f32 %v3334_v0, %v1175_v25  ;;  %v1177_v28 = vpop.f32.mrb[91].mxu1 }
 0x225   :  { %2382 = vst [vmem:[#allocation2 + $0x2c0] sm:$0xff] %v2754_v23  ;;  %v2755_v29 = vpack.c.bf16 %v1449_v24, %v1448_v9  ;;  %v2756_v30 = vpack.c.bf16 %v1451_v26, %v1450_v21  ;;  %v1453_v31 = vmul.f32 %v3337_v19, %v1177_v28 }
 0x227   :  { %2383 = vst [vmem:[#allocation2 + $0x2c8] sm:$0xff] %v2755_v29  ;;  %2384 = vst [vmem:[#allocation2 + $0x2d0] sm:$0xff] %v2756_v30  ;;  %v2757_v32 = vpack.c.bf16 %v1453_v31, %v1452_v27  ;;  %v988_v33 = vpop.f32.mrb[92].mxu0 }
 0x228   :  { %v1454_v34 = vmul.f32 %v3329_v12, %v988_v33  ;;  %v990_v35 = vpop.f32.mrb[93].mxu0 }
 0x229   :  { %2385 = vst [vmem:[#allocation2 + $0x2d8] sm:$0xff] %v2757_v32  ;;  %v1181_v36 = vpop.f32.mrb[92].mxu1  ;;  %v1455_v61 = vmul.f32 %v3331_v14, %v990_v35  ;;  %v992_v37 = vpop.f32.mrb[94].mxu0 }
 0x22a   :  { %v1456_v38 = vmul.f32 %v3334_v0, %v1181_v36  ;;  %v1183_v39 = vpop.f32.mrb[93].mxu1  ;;  %v1458_v56 = vmul.f32 %v3329_v12, %v992_v37  ;;  %v994_v40 = vpop.f32.mrb[95].mxu0 }
 0x22b   :  { %v2758_v62 = vpack.c.bf16 %v1455_v61, %v1454_v34  ;;  %v1457_v41 = vmul.f32 %v3337_v19, %v1183_v39  ;;  %v1185_v42 = vpop.f32.mrb[94].mxu1  ;;  %v1459_v43 = vmul.f32 %v3331_v14, %v994_v40 }
 0x22c   :  { %v1460_v60 = vmul.f32 %v3334_v0, %v1185_v42  ;;  %v1187_v1 = vpop.f32.mrb[95].mxu1 }
 0x22d   :  { %2386 = vst [vmem:[#allocation2 + $0x2e0] sm:$0xff] %v2758_v62  ;;  %v2759_v44 = vpack.c.bf16 %v1457_v41, %v1456_v38  ;;  %v2760_v45 = vpack.c.bf16 %v1459_v43, %v1458_v56  ;;  %v1461_v46 = vmul.f32 %v3337_v19, %v1187_v1 }
 0x22f   :  { %2387 = vst [vmem:[#allocation2 + $0x2e8] sm:$0xff] %v2759_v44  ;;  %2388 = vst [vmem:[#allocation2 + $0x2f0] sm:$0xff] %v2760_v45  ;;  %v2761_v47 = vpack.c.bf16 %v1461_v46, %v1460_v60  ;;  %v998_v48 = vpop.f32.mrb[96].mxu0 }
 0x230   :  { %v1462_v49 = vmul.f32 %v3329_v12, %v998_v48  ;;  %v1000_v50 = vpop.f32.mrb[97].mxu0 }
 0x231   :  { %2389 = vst [vmem:[#allocation2 + $0x2f8] sm:$0xff] %v2761_v47  ;;  %v1191_v51 = vpop.f32.mrb[96].mxu1  ;;  %v1463_v52 = vmul.f32 %v3331_v14, %v1000_v50  ;;  %v1002_v53 = vpop.f32.mrb[98].mxu0 }
 0x232   :  { %v1464_v54 = vmul.f32 %v3334_v0, %v1191_v51  ;;  %v1193_v55 = vpop.f32.mrb[97].mxu1  ;;  %v1466_v57 = vmul.f32 %v3329_v12, %v1002_v53  ;;  %v1004_v58 = vpop.f32.mrb[99].mxu0 }
 0x233   :  { %v2762_v63 = vpack.c.bf16 %v1463_v52, %v1462_v49  ;;  %v1465_v2 = vmul.f32 %v3337_v19, %v1193_v55  ;;  %v1195_v3 = vpop.f32.mrb[98].mxu1  ;;  %v1467_v4 = vmul.f32 %v3331_v14, %v1004_v58 }
 0x234   :  { %v1468_v6 = vmul.f32 %v3334_v0, %v1195_v3  ;;  %v1197_v7 = vpop.f32.mrb[99].mxu1 }
 0x235   :  { %2390 = vst [vmem:[#allocation2 + $0x300] sm:$0xff] %v2762_v63  ;;  %v2763_v8 = vpack.c.bf16 %v1465_v2, %v1464_v54  ;;  %v2764_v10 = vpack.c.bf16 %v1467_v4, %v1466_v57  ;;  %v1469_v11 = vmul.f32 %v3337_v19, %v1197_v7 }
 0x237   :  { %2391 = vst [vmem:[#allocation2 + $0x308] sm:$0xff] %v2763_v8  ;;  %2392 = vst [vmem:[#allocation2 + $0x310] sm:$0xff] %v2764_v10  ;;  %v2765_v59 = vpack.c.bf16 %v1469_v11, %v1468_v6  ;;  %v1008_v13 = vpop.f32.mrb[100].mxu0 }
 0x238   :  { %v1470_v15 = vmul.f32 %v3329_v12, %v1008_v13  ;;  %v1010_v16 = vpop.f32.mrb[101].mxu0 }
 0x239   :  { %2393 = vst [vmem:[#allocation2 + $0x318] sm:$0xff] %v2765_v59  ;;  %v1201_v5 = vpop.f32.mrb[100].mxu1  ;;  %v1471_v17 = vmul.f32 %v3331_v14, %v1010_v16  ;;  %v1012_v18 = vpop.f32.mrb[102].mxu0 }
 0x23a   :  { %v1472_v9 = vmul.f32 %v3334_v0, %v1201_v5  ;;  %v1203_v20 = vpop.f32.mrb[101].mxu1  ;;  %v1474_v21 = vmul.f32 %v3329_v12, %v1012_v18  ;;  %v1014_v22 = vpop.f32.mrb[103].mxu0 }
 0x23b   :  { %v2766_v23 = vpack.c.bf16 %v1471_v17, %v1470_v15  ;;  %v1473_v24 = vmul.f32 %v3337_v19, %v1203_v20  ;;  %v1205_v25 = vpop.f32.mrb[102].mxu1  ;;  %v1475_v26 = vmul.f32 %v3331_v14, %v1014_v22 }
 0x23c   :  { %v1476_v27 = vmul.f32 %v3334_v0, %v1205_v25  ;;  %v1207_v28 = vpop.f32.mrb[103].mxu1 }
 0x23d   :  { %2394 = vst [vmem:[#allocation2 + $0x320] sm:$0xff] %v2766_v23  ;;  %v2767_v29 = vpack.c.bf16 %v1473_v24, %v1472_v9  ;;  %v2768_v30 = vpack.c.bf16 %v1475_v26, %v1474_v21  ;;  %v1477_v31 = vmul.f32 %v3337_v19, %v1207_v28 }
 0x23f   :  { %2395 = vst [vmem:[#allocation2 + $0x328] sm:$0xff] %v2767_v29  ;;  %2396 = vst [vmem:[#allocation2 + $0x330] sm:$0xff] %v2768_v30  ;;  %v2769_v32 = vpack.c.bf16 %v1477_v31, %v1476_v27  ;;  %v1018_v33 = vpop.f32.mrb[104].mxu0 }
 0x240   :  { %v1478_v34 = vmul.f32 %v3329_v12, %v1018_v33  ;;  %v1020_v35 = vpop.f32.mrb[105].mxu0 }
 0x241   :  { %2397 = vst [vmem:[#allocation2 + $0x338] sm:$0xff] %v2769_v32  ;;  %v1211_v36 = vpop.f32.mrb[104].mxu1  ;;  %v1479_v61 = vmul.f32 %v3331_v14, %v1020_v35  ;;  %v1022_v37 = vpop.f32.mrb[106].mxu0 }
 0x242   :  { %v1480_v38 = vmul.f32 %v3334_v0, %v1211_v36  ;;  %v1213_v39 = vpop.f32.mrb[105].mxu1  ;;  %v1482_v56 = vmul.f32 %v3329_v12, %v1022_v37  ;;  %v1024_v40 = vpop.f32.mrb[107].mxu0 }
 0x243   :  { %v2770_v62 = vpack.c.bf16 %v1479_v61, %v1478_v34  ;;  %v1481_v41 = vmul.f32 %v3337_v19, %v1213_v39  ;;  %v1215_v42 = vpop.f32.mrb[106].mxu1  ;;  %v1483_v43 = vmul.f32 %v3331_v14, %v1024_v40 }
 0x244   :  { %v1484_v60 = vmul.f32 %v3334_v0, %v1215_v42  ;;  %v1217_v1 = vpop.f32.mrb[107].mxu1 }
 0x245   :  { %2398 = vst [vmem:[#allocation2 + $0x340] sm:$0xff] %v2770_v62  ;;  %v2771_v44 = vpack.c.bf16 %v1481_v41, %v1480_v38  ;;  %v2772_v45 = vpack.c.bf16 %v1483_v43, %v1482_v56  ;;  %v1485_v46 = vmul.f32 %v3337_v19, %v1217_v1 }
 0x247   :  { %2399 = vst [vmem:[#allocation2 + $0x348] sm:$0xff] %v2771_v44  ;;  %2400 = vst [vmem:[#allocation2 + $0x350] sm:$0xff] %v2772_v45  ;;  %v2773_v47 = vpack.c.bf16 %v1485_v46, %v1484_v60  ;;  %v1028_v48 = vpop.f32.mrb[108].mxu0 }
 0x248   :  { %v1486_v49 = vmul.f32 %v3329_v12, %v1028_v48  ;;  %v1030_v50 = vpop.f32.mrb[109].mxu0 }
 0x249   :  { %2401 = vst [vmem:[#allocation2 + $0x358] sm:$0xff] %v2773_v47  ;;  %v1221_v51 = vpop.f32.mrb[108].mxu1  ;;  %v1487_v52 = vmul.f32 %v3331_v14, %v1030_v50  ;;  %v1032_v53 = vpop.f32.mrb[110].mxu0 }
 0x24a   :  { %v1488_v54 = vmul.f32 %v3334_v0, %v1221_v51  ;;  %v1223_v55 = vpop.f32.mrb[109].mxu1  ;;  %v1490_v57 = vmul.f32 %v3329_v12, %v1032_v53  ;;  %v1034_v58 = vpop.f32.mrb[111].mxu0 }
 0x24b   :  { %v2774_v63 = vpack.c.bf16 %v1487_v52, %v1486_v49  ;;  %v1489_v2 = vmul.f32 %v3337_v19, %v1223_v55  ;;  %v1225_v3 = vpop.f32.mrb[110].mxu1  ;;  %v1491_v4 = vmul.f32 %v3331_v14, %v1034_v58 }
 0x24c   :  { %v1492_v6 = vmul.f32 %v3334_v0, %v1225_v3  ;;  %v1227_v7 = vpop.f32.mrb[111].mxu1 }
 0x24d   :  { %2402 = vst [vmem:[#allocation2 + $0x360] sm:$0xff] %v2774_v63  ;;  %v2775_v8 = vpack.c.bf16 %v1489_v2, %v1488_v54  ;;  %v2776_v10 = vpack.c.bf16 %v1491_v4, %v1490_v57  ;;  %v1493_v11 = vmul.f32 %v3337_v19, %v1227_v7 }
 0x24f   :  { %2403 = vst [vmem:[#allocation2 + $0x368] sm:$0xff] %v2775_v8  ;;  %2404 = vst [vmem:[#allocation2 + $0x370] sm:$0xff] %v2776_v10  ;;  %v2777_v59 = vpack.c.bf16 %v1493_v11, %v1492_v6  ;;  %v1038_v13 = vpop.f32.mrb[112].mxu0 }
 0x250   :  { %v1494_v15 = vmul.f32 %v3329_v12, %v1038_v13  ;;  %v1040_v16 = vpop.f32.mrb[113].mxu0 }
 0x251   :  { %2405 = vst [vmem:[#allocation2 + $0x378] sm:$0xff] %v2777_v59  ;;  %v1231_v5 = vpop.f32.mrb[112].mxu1  ;;  %v1495_v17 = vmul.f32 %v3331_v14, %v1040_v16  ;;  %v1042_v18 = vpop.f32.mrb[114].mxu0 }
 0x252   :  { %v1496_v9 = vmul.f32 %v3334_v0, %v1231_v5  ;;  %v1233_v20 = vpop.f32.mrb[113].mxu1  ;;  %v1498_v21 = vmul.f32 %v3329_v12, %v1042_v18  ;;  %v1044_v22 = vpop.f32.mrb[115].mxu0 }
 0x253   :  { %v2778_v23 = vpack.c.bf16 %v1495_v17, %v1494_v15  ;;  %v1497_v24 = vmul.f32 %v3337_v19, %v1233_v20  ;;  %v1235_v25 = vpop.f32.mrb[114].mxu1  ;;  %v1499_v26 = vmul.f32 %v3331_v14, %v1044_v22 }
 0x254   :  { %v1500_v27 = vmul.f32 %v3334_v0, %v1235_v25  ;;  %v1237_v28 = vpop.f32.mrb[115].mxu1 }
 0x255   :  { %2406 = vst [vmem:[#allocation2 + $0x380] sm:$0xff] %v2778_v23  ;;  %v2779_v29 = vpack.c.bf16 %v1497_v24, %v1496_v9  ;;  %v2780_v30 = vpack.c.bf16 %v1499_v26, %v1498_v21  ;;  %v1501_v31 = vmul.f32 %v3337_v19, %v1237_v28 }
 0x257   :  { %2407 = vst [vmem:[#allocation2 + $0x388] sm:$0xff] %v2779_v29  ;;  %2408 = vst [vmem:[#allocation2 + $0x390] sm:$0xff] %v2780_v30  ;;  %v2781_v32 = vpack.c.bf16 %v1501_v31, %v1500_v27  ;;  %v1048_v33 = vpop.f32.mrb[116].mxu0 }
 0x258   :  { %v1502_v34 = vmul.f32 %v3329_v12, %v1048_v33  ;;  %v1050_v35 = vpop.f32.mrb[117].mxu0 }
 0x259   :  { %2409 = vst [vmem:[#allocation2 + $0x398] sm:$0xff] %v2781_v32  ;;  %v1241_v36 = vpop.f32.mrb[116].mxu1  ;;  %v1503_v61 = vmul.f32 %v3331_v14, %v1050_v35  ;;  %v1052_v37 = vpop.f32.mrb[118].mxu0 }
 0x25a   :  { %v1504_v38 = vmul.f32 %v3334_v0, %v1241_v36  ;;  %v1243_v39 = vpop.f32.mrb[117].mxu1  ;;  %v1506_v56 = vmul.f32 %v3329_v12, %v1052_v37  ;;  %v1054_v40 = vpop.f32.mrb[119].mxu0 }
 0x25b   :  { %v2782_v62 = vpack.c.bf16 %v1503_v61, %v1502_v34  ;;  %v1505_v41 = vmul.f32 %v3337_v19, %v1243_v39  ;;  %v1245_v42 = vpop.f32.mrb[118].mxu1  ;;  %v1507_v43 = vmul.f32 %v3331_v14, %v1054_v40 }
 0x25c   :  { %v1508_v60 = vmul.f32 %v3334_v0, %v1245_v42  ;;  %v1247_v1 = vpop.f32.mrb[119].mxu1 }
 0x25d   :  { %2410 = vst [vmem:[#allocation2 + $0x3a0] sm:$0xff] %v2782_v62  ;;  %v2783_v44 = vpack.c.bf16 %v1505_v41, %v1504_v38  ;;  %v2784_v45 = vpack.c.bf16 %v1507_v43, %v1506_v56  ;;  %v1509_v46 = vmul.f32 %v3337_v19, %v1247_v1 }
 0x25f   :  { %2411 = vst [vmem:[#allocation2 + $0x3a8] sm:$0xff] %v2783_v44  ;;  %2412 = vst [vmem:[#allocation2 + $0x3b0] sm:$0xff] %v2784_v45  ;;  %v2785_v47 = vpack.c.bf16 %v1509_v46, %v1508_v60  ;;  %v1058_v48 = vpop.f32.mrb[120].mxu0 }
 0x260   :  { %v1510_v49 = vmul.f32 %v3329_v12, %v1058_v48  ;;  %v1060_v50 = vpop.f32.mrb[121].mxu0 }
 0x261   :  { %2413 = vst [vmem:[#allocation2 + $0x3b8] sm:$0xff] %v2785_v47  ;;  %v1251_v51 = vpop.f32.mrb[120].mxu1  ;;  %v1511_v52 = vmul.f32 %v3331_v14, %v1060_v50  ;;  %v1062_v53 = vpop.f32.mrb[122].mxu0 }
 0x262   :  { %v1512_v54 = vmul.f32 %v3334_v0, %v1251_v51  ;;  %v1253_v55 = vpop.f32.mrb[121].mxu1  ;;  %v1514_v57 = vmul.f32 %v3329_v12, %v1062_v53  ;;  %v1064_v58 = vpop.f32.mrb[123].mxu0 }
 0x263   :  { %v2786_v63 = vpack.c.bf16 %v1511_v52, %v1510_v49  ;;  %v1513_v2 = vmul.f32 %v3337_v19, %v1253_v55  ;;  %v1255_v3 = vpop.f32.mrb[122].mxu1  ;;  %v1515_v4 = vmul.f32 %v3331_v14, %v1064_v58 }
 0x264   :  { %v1516_v6 = vmul.f32 %v3334_v0, %v1255_v3  ;;  %v1257_v7 = vpop.f32.mrb[123].mxu1 }
 0x265   :  { %2414 = vst [vmem:[#allocation2 + $0x3c0] sm:$0xff] %v2786_v63  ;;  %v2787_v8 = vpack.c.bf16 %v1513_v2, %v1512_v54  ;;  %v2788_v10 = vpack.c.bf16 %v1515_v4, %v1514_v57  ;;  %v1517_v11 = vmul.f32 %v3337_v19, %v1257_v7 }
 0x267   :  { %2415 = vst [vmem:[#allocation2 + $0x3c8] sm:$0xff] %v2787_v8  ;;  %2416 = vst [vmem:[#allocation2 + $0x3d0] sm:$0xff] %v2788_v10  ;;  %v2789_v59 = vpack.c.bf16 %v1517_v11, %v1516_v6  ;;  %v1068_v13 = vpop.f32.mrb[124].mxu0 }
 0x268   :  { %v1518_v15 = vmul.f32 %v3329_v12, %v1068_v13  ;;  %v1070_v16 = vpop.f32.mrb[125].mxu0 }
 0x269   :  { %2417 = vst [vmem:[#allocation2 + $0x3d8] sm:$0xff] %v2789_v59  ;;  %v1261_v5 = vpop.f32.mrb[124].mxu1  ;;  %v1519_v17 = vmul.f32 %v3331_v14, %v1070_v16  ;;  %v1072_v18 = vpop.f32.mrb[126].mxu0 }
 0x26a   :  { %v1520_v9 = vmul.f32 %v3334_v0, %v1261_v5  ;;  %v1263_v20 = vpop.f32.mrb[125].mxu1  ;;  %v1522_v21 = vmul.f32 %v3329_v12, %v1072_v18  ;;  %v1074_v22 = vpop.f32.mrb[127].mxu0 }
 0x26b   :  { %v2790_v23 = vpack.c.bf16 %v1519_v17, %v1518_v15  ;;  %v1521_v24 = vmul.f32 %v3337_v19, %v1263_v20  ;;  %v1265_v25 = vpop.f32.mrb[126].mxu1  ;;  %v1523_v26 = vmul.f32 %v3331_v14, %v1074_v22 }
 0x26c   :  { %v1524_v27 = vmul.f32 %v3334_v0, %v1265_v25  ;;  %v1267_v28 = vpop.f32.mrb[127].mxu1 }
 0x26d   :  { %2418 = vst [vmem:[#allocation2 + $0x3e0] sm:$0xff] %v2790_v23  ;;  %v2791_v29 = vpack.c.bf16 %v1521_v24, %v1520_v9  ;;  %v2792_v30 = vpack.c.bf16 %v1523_v26, %v1522_v21  ;;  %v1525_v31 = vmul.f32 %v3337_v19, %v1267_v28 }
 0x26f   :  { %2419 = vst [vmem:[#allocation2 + $0x3e8] sm:$0xff] %v2791_v29  ;;  %2420 = vst [vmem:[#allocation2 + $0x3f0] sm:$0xff] %v2792_v30  ;;  %v2793_v12 = vpack.c.bf16 %v1525_v31, %v1524_v27 }
 0x271   :  { %2421 = vst [vmem:[#allocation2 + $0x3f8] sm:$0xff] %v2793_v12 }
 0x272   :  { %2874 = shalt.err (!%p2871_p4)
}
 0x273   :  { %s2875_s22 = scalar_lea.hbm %s3479_s2, 16384 }
 0x274   :  { %p2876_p5 = scmp.ne.s32.totalorder %s3479_s2, %s2875_s22  ;;  %p2879_p6 = scmp.lt.u32.totalorder %s2875_s22, %s3479_s2 }
 0x276   :  { %p2881_p7 = pnand %p2879_p6, %p2876_p5 }
 0x278   :  { %2884 = shalt.err (!%p2881_p7)
}
 0x279   :  { %s2889_s27 = smov 256   ;;  %s2890_s28 = smov 16  }
 0x27a   :  { %2433 = dma.vmem_to_hbm [thread:$0]  %s2428_s18, 16384, %s3479_s2, [#allocation3], %s2889_s27, %s2889_s27, %s2890_s28  }
 0x27b   :  { %2885 = dma.done.wait [#allocation3], 16384  }
 0x27c   :  { %2886 = vsyncadd [#allocation3], 4294950912 }
 0x27d   :  { %2437 = vsyncpa [#allocation3], 1 }

</bundles_post_ra>
